<compile_context>
chip_gen: v7x
topology: tpu7x:2x2x1
jax: 0.10.0
libtpu: 0.0.40
codegen_flags: <defaults>
</compile_context>

<pallas_src>
import functools

import jax
import jax.numpy as jnp
from jax import lax
from jax.experimental import pallas as pl
from jax.experimental.pallas import tpu as pltpu


_EPS = 1e-12
_PACK_LANES = 128  # lane-dense width of the packed per-row LID output


# ----------------------------------------------------------------------------
# Kernel 1: fused model projection + cross-entropy/accuracy + cdist
# ----------------------------------------------------------------------------

def _model_ce_cdist_kernel(labels_ref, x_ref, wp_ref, wc_ref,
                           dist_ref, scal_ref, *, batch, n_classes):
    x = x_ref[...]                                                  # (B, CHW) f32
    feat = jnp.dot(x, wp_ref[...], preferred_element_type=jnp.float32)      # (B, D)
    logits = jnp.dot(feat, wc_ref[...], preferred_element_type=jnp.float32)  # (B, C)
    d_feat = feat.shape[-1]

    # ---- pairwise squared-distance pieces (MXU 'NT' matmul, no transpose) ----
    gram = lax.dot_general(feat, feat, (((1,), (1,)), ((), ())),
                           preferred_element_type=jnp.float32)      # (B, B)
    ri = lax.broadcasted_iota(jnp.int32, gram.shape, 0)
    ci = lax.broadcasted_iota(jnp.int32, gram.shape, 1)
    diag = jnp.where(ri == ci, gram, 0.0)
    sq_col = jnp.sum(diag, axis=1, keepdims=True)                   # (B, 1)  ||f_i||^2
    sq_row = jnp.sum(diag, axis=0, keepdims=True)                   # (1, B)  ||f_j||^2

    # ---- placeholder MAE "main" loss: mean(cls_token ** 2) -------------------
    main_loss = jnp.sum(sq_col) * (1.0 / (batch * d_feat))

    # ---- cross entropy + top-1 accuracy (one-hot built in-kernel) ------------
    labels = labels_ref[...]                                        # (B, 1) int32
    col = lax.broadcasted_iota(jnp.int32, logits.shape, 1)          # (B, C)
    onehot = col == labels
    m = jnp.max(logits, axis=-1, keepdims=True)
    lse = jnp.log(jnp.sum(jnp.exp(logits - m), axis=-1, keepdims=True)) + m
    label_logit = jnp.sum(jnp.where(onehot, logits, 0.0), axis=-1, keepdims=True)
    ce = jnp.sum(lse - label_logit) * (1.0 / batch)
    # first-argmax prediction (matches torch argmax tie-breaking)
    col_f = col.astype(jnp.float32)
    pred = jnp.min(jnp.where(logits >= m, col_f, float(n_classes)),
                   axis=-1, keepdims=True)
    correct = (pred == labels.astype(jnp.float32)).astype(jnp.float32)
    acc = jnp.sum(correct) * (100.0 / batch)

    # ---- euclidean distance matrix (exact 0 on the diagonal) -----------------
    d2 = sq_col + sq_row - 2.0 * gram
    d2 = jnp.where(ri == ci, 0.0, jnp.maximum(d2, 0.0))
    dist_ref[...] = jnp.sqrt(d2)

    scal_ref[0] = main_loss
    scal_ref[1] = ce
    scal_ref[2] = acc


def fused_model_ce_cdist(x_flat, labels_2d, w_proj, w_cls):
    B = x_flat.shape[0]
    n_classes = w_cls.shape[1]
    # NOTE: at these sizes everything fits a single VMEM block.  For large B,
    # raise pltpu.CompilerParams(vmem_limit_bytes=...) or tile dist into an
    # (i, j) grid (mandatory on v7x's 64 MiB VMEM once B*B*4 gets large).
    return pl.pallas_call(
        functools.partial(_model_ce_cdist_kernel, batch=B, n_classes=n_classes),
        out_shape=(
            jax.ShapeDtypeStruct((B, B), jnp.float32),   # distance matrix
            jax.ShapeDtypeStruct((3,), jnp.float32),     # [main_loss, ce, acc]
        ),
        in_specs=[
            pl.BlockSpec(memory_space=pltpu.MemorySpace.VMEM),  # labels (B,1) i32
            pl.BlockSpec(memory_space=pltpu.MemorySpace.VMEM),  # x_flat
            pl.BlockSpec(memory_space=pltpu.MemorySpace.VMEM),  # w_proj
            pl.BlockSpec(memory_space=pltpu.MemorySpace.VMEM),  # w_cls
        ],
        out_specs=(
            pl.BlockSpec(memory_space=pltpu.MemorySpace.VMEM),
            pl.BlockSpec(memory_space=pltpu.MemorySpace.SMEM),
        ),
    )(labels_2d, x_flat, w_proj, w_cls)


# ----------------------------------------------------------------------------
# Kernel 2: fused LID estimators (MoM regularizer + MLE k=32 / k=512 trackers)
# ----------------------------------------------------------------------------

def _fused_lid_kernel(sorted_ref, packed_ref, scal_ref,
                      *, k_mom, k32, k512, batch):
    a = sorted_ref[...]                                   # (B, R) ascending dists
    col = lax.broadcasted_iota(jnp.int32, a.shape, 1)

    def kth_col(k):
        # distance to the k-th neighbour via lane-dense masked reduction
        return jnp.sum(jnp.where(col == k, a, 0.0), axis=-1, keepdims=True)

    def neigh_sum(vals, k):
        # sum over neighbour columns 1..k-1 (column 0 is the self-distance)
        return jnp.sum(jnp.where((col >= 1) & (col < k), vals, 0.0),
                       axis=-1, keepdims=True)

    # ---- MoM LID estimate + LDReg regularizer --------------------------------
    m = neigh_sum(a, k_mom) * (1.0 / (k_mom - 1))
    ak = kth_col(k_mom)
    lids_mom = m * pl.reciprocal(jnp.maximum(ak - m, _EPS), approx=True)
    # reference: l1 -> -|log(lid)| ; l2 -> -sqrt(square(log(lid))) == -|log(lid)|
    reg = -jnp.abs(jnp.log(lids_mom + _EPS))              # (B, 1)
    scal_ref[0] = jnp.sum(reg) * (1.0 / batch)

    # ---- MLE LID estimates (tracking) ----------------------------------------
    def lid_mle(k):
        akk = kth_col(k)
        logr = jnp.log(a * pl.reciprocal(akk + _EPS, approx=True) + _EPS)
        s = neigh_sum(logr, k)                            # <= 0 up to eps
        return -float(k) * pl.reciprocal(jnp.minimum(s, -_EPS), approx=True)

    lids32 = lid_mle(k32)
    lids512 = lid_mle(k512)

    # ---- pack per-row stats into one lane-dense (B, 128) output --------------
    lane = lax.broadcasted_iota(jnp.int32, packed_ref.shape, 1)
    packed = jnp.where(lane == 0, lids32, 0.0)
    packed = jnp.where(lane == 1, lids512, packed)
    packed = jnp.where(lane == 2, reg, packed)
    packed_ref[...] = packed


def fused_lid_stats(sorted_d, k_mom, k32, k512):
    B = sorted_d.shape[0]
    return pl.pallas_call(
        functools.partial(_fused_lid_kernel,
                          k_mom=k_mom, k32=k32, k512=k512, batch=B),
        out_shape=(
            jax.ShapeDtypeStruct((B, _PACK_LANES), jnp.float32),  # packed rows
            jax.ShapeDtypeStruct((1,), jnp.float32),              # reg_mean
        ),
        in_specs=[pl.BlockSpec(memory_space=pltpu.MemorySpace.VMEM)],
        out_specs=(
            pl.BlockSpec(memory_space=pltpu.MemorySpace.VMEM),
            pl.BlockSpec(memory_space=pltpu.MemorySpace.SMEM),
        ),
    )(sorted_d)


# ----------------------------------------------------------------------------
# Forward pass (jitted glue) + loss module
# ----------------------------------------------------------------------------

@functools.partial(jax.jit, static_argnames=("k", "alpha"))
def maeldreg_forward(images, online_labels, w_proj, w_cls, *, k=20, alpha=1.0):
    B = images.shape[0]
    x_flat = images.reshape(B, -1).astype(jnp.float32)
    labels_2d = online_labels.astype(jnp.int32).reshape(B, 1)

    dist, scal1 = fused_model_ce_cdist(x_flat, labels_2d, w_proj, w_cls)
    main_loss, online_ce, online_acc = scal1[0], scal1[1], scal1[2]

    k_mom = min(k, B - 1)
    k32 = min(32, B - 1)
    k512 = min(512, B - 1)
    assert k_mom >= 2
    kmax = max(k_mom, k32, k512)

    # only the kmax+1 smallest distances per row are needed (col 0 = self);
    # top_k on the negated distances gives them ascending after negation.
    neg_top, _ = lax.top_k(-dist, kmax + 1)
    sorted_d = -neg_top                                    # (B, kmax+1)

    packed, scal2 = fused_lid_stats(sorted_d, k_mom, k32, k512)
    reg_mean = scal2[0]
    lids32 = packed[:, 0]
    lids512 = packed[:, 1]

    total_loss = main_loss + alpha * reg_mean
    return {
        "loss": total_loss,
        "lids32": lids32,
        "lids512": lids512,
        "reg_loss": reg_mean,
        "main_loss": main_loss,
        "online_acc": online_acc,
        "online_ce": online_ce,
    }


class MAELDRegLossPallas:
    """JAX/Pallas port of MAELDRegLoss.forward (est_type='mom')."""

    def __init__(self, reg_type="l1", alpha=1.0, k=20, warmup_epochs=0):
        # l1 and l2 in the reference both evaluate to -|log(lid)|
        # (l2 is -sqrt(square(log(lid)))), so they share a single code path.
        assert reg_type in ("l1", "l2")
        self.alpha = alpha
        self.k = k
        self.reg_type = reg_type
        self.warmup_epochs = warmup_epochs
        self.epoch = 0

    def forward(self, images, online_labels, w_proj, w_cls):
        # TODO(synk): the real MAE backbone (+ its masked-reconstruction loss)
        # and the online_prob_loss.backward() optimizer side-effect are external
        # to this forward-only loss module; a deterministic Pallas projection
        # head stands in for the model.
        out = maeldreg_forward(images, online_labels, w_proj, w_cls,
                               k=self.k, alpha=self.alpha)
        if self.epoch < self.warmup_epochs:
            out = dict(out)
            out["loss"] = out["main_loss"]   # warmup: no LID regularization
        return out


# ----------------------------------------------------------------------------
# Main
# ----------------------------------------------------------------------------

if __name__ == "__main__":
    key = jax.random.PRNGKey(0)
    k1, k2, k3, k4 = jax.random.split(key, 4)

    B, C_img, H, W = 64, 3, 8, 8
    D_feat, n_classes = 128, 16

    images = jax.random.normal(k1, (B, C_img, H, W), dtype=jnp.float32)
    online_labels = jax.random.randint(k2, (B,), 0, n_classes)
    w_proj = 0.05 * jax.random.normal(k3, (C_img * H * W, D_feat), dtype=jnp.float32)
    w_cls = 0.05 * jax.random.normal(k4, (D_feat, n_classes), dtype=jnp.float32)

    loss_mod = MAELDRegLossPallas(reg_type="l1", alpha=1.0, k=20, warmup_epochs=0)
    results = loss_mod.forward(images, online_labels, w_proj, w_cls)
    results = jax.block_until_ready(results)

    assert results["loss"].shape == ()
    assert results["lids32"].shape == (B,)
    assert results["lids512"].shape == (B,)
    assert bool(jnp.isfinite(results["loss"]))
    assert bool(jnp.all(jnp.isfinite(results["lids32"])))
    assert bool(jnp.all(jnp.isfinite(results["lids512"])))

    print("KERNEL_OK")
</pallas_src>

<mosaic_0001>
module attributes {stable_mosaic.version = 11 : i64} {
  func.func @_model_ce_cdist_kernel(%arg0: memref<64x1xi32, #tpu.memory_space<vmem>>, %arg1: memref<64x192xf32, #tpu.memory_space<vmem>>, %arg2: memref<192x128xf32, #tpu.memory_space<vmem>>, %arg3: memref<128x16xf32, #tpu.memory_space<vmem>>, %arg4: memref<64x64xf32, #tpu.memory_space<vmem>>, %arg5: memref<3xf32, #tpu.memory_space<smem>>) attributes {dimension_semantics = [], scalar_prefetch = 0 : i64, scratch_operands = 0 : i64, tpu.core_type = #tpu.core_type<tc>} {
    %c0 = arith.constant 0 : index
    %c0_0 = arith.constant 0 : index
    %0 = vector.load %arg1[%c0, %c0_0] : memref<64x192xf32, #tpu.memory_space<vmem>>, vector<64x192xf32>
    %c0_1 = arith.constant 0 : index
    %c0_2 = arith.constant 0 : index
    %1 = vector.load %arg2[%c0_1, %c0_2] : memref<192x128xf32, #tpu.memory_space<vmem>>, vector<192x128xf32>
    %cst = arith.constant dense<0.000000e+00> : vector<64x128xf32>
    %2 = tpu.matmul %0, %1, %cst {dimension_numbers = #tpu.dot_dimension_numbers<[1], [0], [0], [1], [0, 0, 1, 1], [], []>} : vector<64x192xf32>, vector<192x128xf32>, vector<64x128xf32> -> vector<64x128xf32>
    %c0_3 = arith.constant 0 : index
    %c0_4 = arith.constant 0 : index
    %3 = vector.load %arg3[%c0_3, %c0_4] : memref<128x16xf32, #tpu.memory_space<vmem>>, vector<128x16xf32>
    %cst_5 = arith.constant dense<0.000000e+00> : vector<64x16xf32>
    %4 = tpu.matmul %2, %3, %cst_5 {dimension_numbers = #tpu.dot_dimension_numbers<[1], [0], [0], [1], [0, 0, 1, 1], [], []>} : vector<64x128xf32>, vector<128x16xf32>, vector<64x16xf32> -> vector<64x16xf32>
    %cst_6 = arith.constant dense<0.000000e+00> : vector<64x64xf32>
    %5 = tpu.matmul %2, %2, %cst_6 {dimension_numbers = #tpu.dot_dimension_numbers<[1], [1], [0], [0], [0, 0, 1, 0], [], []>} : vector<64x128xf32>, vector<64x128xf32>, vector<64x64xf32> -> vector<64x64xf32>
    %6 = tpu.iota {dimensions = array<i32: 0>} : vector<64x64xi32>
    %7 = tpu.iota {dimensions = array<i32: 1>} : vector<64x64xi32>
    %8 = arith.cmpi eq, %6, %7 : vector<64x64xi32>
    %cst_7 = arith.constant 0.000000e+00 : f32
    %9 = vector.broadcast %cst_7 : f32 to vector<64x64xf32>
    %10 = arith.select %8, %5, %9 : vector<64x64xi1>, vector<64x64xf32>
    %cst_8 = arith.constant dense<0.000000e+00> : vector<64xf32>
    %11 = vector.multi_reduction <add>, %10, %cst_8 [1] : vector<64x64xf32> to vector<64xf32>
    %12 = vector.shape_cast %11 : vector<64xf32> to vector<64x1xf32>
    %cst_9 = arith.constant dense<0.000000e+00> : vector<64xf32>
    %13 = vector.multi_reduction <add>, %10, %cst_9 [0] : vector<64x64xf32> to vector<64xf32>
    %14 = vector.shape_cast %13 : vector<64xf32> to vector<1x64xf32>
    %15 = vector.shape_cast %12 : vector<64x1xf32> to vector<1x64x1xf32>
    %cst_10 = arith.constant dense<0.000000e+00> : vector<1xf32>
    %16 = vector.multi_reduction <add>, %15, %cst_10 [1, 2] : vector<1x64x1xf32> to vector<1xf32>
    %17 = vector.shape_cast %16 : vector<1xf32> to vector<1x1x1xf32>
    %18 = vector.extract %17[0, 0, 0] : f32 from vector<1x1x1xf32>
    %cst_11 = arith.constant 1.22070313E-4 : f32
    %19 = arith.mulf %18, %cst_11 : f32
    %c0_12 = arith.constant 0 : index
    %c0_13 = arith.constant 0 : index
    %20 = vector.load %arg0[%c0_12, %c0_13] : memref<64x1xi32, #tpu.memory_space<vmem>>, vector<64x1xi32>
    %21 = tpu.iota {dimensions = array<i32: 1>} : vector<64x16xi32>
    %22 = vector.broadcast %20 : vector<64x1xi32> to vector<64x16xi32>
    %23 = arith.cmpi eq, %21, %22 : vector<64x16xi32>
    %cst_14 = arith.constant dense<0xFF800000> : vector<64xf32>
    %24 = vector.multi_reduction <maximumf>, %4, %cst_14 [1] : vector<64x16xf32> to vector<64xf32>
    %25 = vector.shape_cast %24 : vector<64xf32> to vector<64x1xf32>
    %26 = vector.broadcast %25 : vector<64x1xf32> to vector<64x16xf32>
    %27 = arith.subf %4, %26 : vector<64x16xf32>
    %28 = math.exp %27 : vector<64x16xf32>
    %cst_15 = arith.constant dense<0.000000e+00> : vector<64xf32>
    %29 = vector.multi_reduction <add>, %28, %cst_15 [1] : vector<64x16xf32> to vector<64xf32>
    %30 = vector.shape_cast %29 : vector<64xf32> to vector<64x1xf32>
    %31 = math.log %30 : vector<64x1xf32>
    %32 = arith.addf %31, %25 : vector<64x1xf32>
    %cst_16 = arith.constant 0.000000e+00 : f32
    %33 = vector.broadcast %cst_16 : f32 to vector<64x16xf32>
    %34 = arith.select %23, %4, %33 : vector<64x16xi1>, vector<64x16xf32>
    %cst_17 = arith.constant dense<0.000000e+00> : vector<64xf32>
    %35 = vector.multi_reduction <add>, %34, %cst_17 [1] : vector<64x16xf32> to vector<64xf32>
    %36 = vector.shape_cast %35 : vector<64xf32> to vector<64x1xf32>
    %37 = arith.subf %32, %36 : vector<64x1xf32>
    %38 = vector.shape_cast %37 : vector<64x1xf32> to vector<1x64x1xf32>
    %cst_18 = arith.constant dense<0.000000e+00> : vector<1xf32>
    %39 = vector.multi_reduction <add>, %38, %cst_18 [1, 2] : vector<1x64x1xf32> to vector<1xf32>
    %40 = vector.shape_cast %39 : vector<1xf32> to vector<1x1x1xf32>
    %41 = vector.extract %40[0, 0, 0] : f32 from vector<1x1x1xf32>
    %cst_19 = arith.constant 1.562500e-02 : f32
    %42 = arith.mulf %41, %cst_19 : f32
    %43 = arith.sitofp %21 : vector<64x16xi32> to vector<64x16xf32>
    %44 = vector.broadcast %25 : vector<64x1xf32> to vector<64x16xf32>
    %45 = arith.cmpf oge, %4, %44 : vector<64x16xf32>
    %cst_20 = arith.constant 1.600000e+01 : f32
    %46 = vector.broadcast %cst_20 : f32 to vector<64x16xf32>
    %47 = arith.select %45, %43, %46 : vector<64x16xi1>, vector<64x16xf32>
    %cst_21 = arith.constant dense<0x7F800000> : vector<64xf32>
    %48 = vector.multi_reduction <minimumf>, %47, %cst_21 [1] : vector<64x16xf32> to vector<64xf32>
    %49 = vector.shape_cast %48 : vector<64xf32> to vector<64x1xf32>
    %50 = arith.sitofp %20 : vector<64x1xi32> to vector<64x1xf32>
    %51 = arith.cmpf oeq, %49, %50 : vector<64x1xf32>
    %52 = arith.extui %51 : vector<64x1xi1> to vector<64x1xi32>
    %53 = arith.sitofp %52 : vector<64x1xi32> to vector<64x1xf32>
    %54 = vector.shape_cast %53 : vector<64x1xf32> to vector<1x64x1xf32>
    %cst_22 = arith.constant dense<0.000000e+00> : vector<1xf32>
    %55 = vector.multi_reduction <add>, %54, %cst_22 [1, 2] : vector<1x64x1xf32> to vector<1xf32>
    %56 = vector.shape_cast %55 : vector<1xf32> to vector<1x1x1xf32>
    %57 = vector.extract %56[0, 0, 0] : f32 from vector<1x1x1xf32>
    %cst_23 = arith.constant 1.562500e+00 : f32
    %58 = arith.mulf %57, %cst_23 : f32
    %59 = vector.broadcast %12 : vector<64x1xf32> to vector<64x64xf32>
    %60 = vector.broadcast %14 : vector<1x64xf32> to vector<64x64xf32>
    %61 = arith.addf %59, %60 : vector<64x64xf32>
    %cst_24 = arith.constant 2.000000e+00 : f32
    %62 = vector.broadcast %cst_24 : f32 to vector<64x64xf32>
    %63 = arith.mulf %62, %5 : vector<64x64xf32>
    %64 = arith.subf %61, %63 : vector<64x64xf32>
    %65 = arith.cmpi eq, %6, %7 : vector<64x64xi32>
    %cst_25 = arith.constant 0.000000e+00 : f32
    %66 = vector.broadcast %cst_25 : f32 to vector<64x64xf32>
    %67 = arith.maximumf %64, %66 : vector<64x64xf32>
    %cst_26 = arith.constant 0.000000e+00 : f32
    %68 = vector.broadcast %cst_26 : f32 to vector<64x64xf32>
    %69 = arith.select %65, %68, %67 : vector<64x64xi1>, vector<64x64xf32>
    %70 = math.sqrt %69 : vector<64x64xf32>
    %c0_27 = arith.constant 0 : index
    %c0_28 = arith.constant 0 : index
    %71 = vector.load %arg4[%c0_27, %c0_28] : memref<64x64xf32, #tpu.memory_space<vmem>>, vector<64x64xf32>
    tpu.vector_store %arg4[%c0_27, %c0_28], %70 {strides = array<i32>} : memref<64x64xf32, #tpu.memory_space<vmem>>, vector<64x64xf32>,
    %c0_29 = arith.constant 0 : index
    %72 = memref.load %arg5[%c0_29] : memref<3xf32, #tpu.memory_space<smem>>
    memref.store %19, %arg5[%c0_29] : memref<3xf32, #tpu.memory_space<smem>>
    %c1 = arith.constant 1 : index
    %73 = memref.load %arg5[%c1] : memref<3xf32, #tpu.memory_space<smem>>
    memref.store %42, %arg5[%c1] : memref<3xf32, #tpu.memory_space<smem>>
    %c2 = arith.constant 2 : index
    %74 = memref.load %arg5[%c2] : memref<3xf32, #tpu.memory_space<smem>>
    memref.store %58, %arg5[%c2] : memref<3xf32, #tpu.memory_space<smem>>
    return
  }
}

module attributes {stable_mosaic.version = 11 : i64} {
  func.func @_fused_lid_kernel(%arg0: memref<64x64xf32, #tpu.memory_space<vmem>>, %arg1: memref<64x128xf32, #tpu.memory_space<vmem>>, %arg2: memref<1xf32, #tpu.memory_space<smem>>) attributes {dimension_semantics = [], scalar_prefetch = 0 : i64, scratch_operands = 0 : i64, tpu.core_type = #tpu.core_type<tc>} {
    %c0 = arith.constant 0 : index
    %c0_0 = arith.constant 0 : index
    %0 = vector.load %arg0[%c0, %c0_0] : memref<64x64xf32, #tpu.memory_space<vmem>>, vector<64x64xf32>
    %1 = tpu.iota {dimensions = array<i32: 1>} : vector<64x64xi32>
    %c1_i32 = arith.constant 1 : i32
    %2 = vector.broadcast %c1_i32 : i32 to vector<64x64xi32>
    %3 = arith.cmpi sge, %1, %2 : vector<64x64xi32>
    %c20_i32 = arith.constant 20 : i32
    %4 = vector.broadcast %c20_i32 : i32 to vector<64x64xi32>
    %5 = arith.cmpi slt, %1, %4 : vector<64x64xi32>
    %6 = arith.andi %3, %5 : vector<64x64xi1>
    %cst = arith.constant 0.000000e+00 : f32
    %7 = vector.broadcast %cst : f32 to vector<64x64xf32>
    %8 = arith.select %6, %0, %7 : vector<64x64xi1>, vector<64x64xf32>
    %cst_1 = arith.constant dense<0.000000e+00> : vector<64xf32>
    %9 = vector.multi_reduction <add>, %8, %cst_1 [1] : vector<64x64xf32> to vector<64xf32>
    %10 = vector.shape_cast %9 : vector<64xf32> to vector<64x1xf32>
    %cst_2 = arith.constant 0.0526315793 : f32
    %11 = vector.broadcast %cst_2 : f32 to vector<64x1xf32>
    %12 = arith.mulf %10, %11 : vector<64x1xf32>
    %c20_i32_3 = arith.constant 20 : i32
    %13 = vector.broadcast %c20_i32_3 : i32 to vector<64x64xi32>
    %14 = arith.cmpi eq, %1, %13 : vector<64x64xi32>
    %cst_4 = arith.constant 0.000000e+00 : f32
    %15 = vector.broadcast %cst_4 : f32 to vector<64x64xf32>
    %16 = arith.select %14, %0, %15 : vector<64x64xi1>, vector<64x64xf32>
    %cst_5 = arith.constant dense<0.000000e+00> : vector<64xf32>
    %17 = vector.multi_reduction <add>, %16, %cst_5 [1] : vector<64x64xf32> to vector<64xf32>
    %18 = vector.shape_cast %17 : vector<64xf32> to vector<64x1xf32>
    %19 = arith.subf %18, %12 : vector<64x1xf32>
    %cst_6 = arith.constant 9.99999996E-13 : f32
    %20 = vector.broadcast %cst_6 : f32 to vector<64x1xf32>
    %21 = arith.maximumf %19, %20 : vector<64x1xf32>
    %22 = tpu.reciprocal %21 {approx = true} : vector<64x1xf32> -> vector<64x1xf32>
    %23 = arith.mulf %12, %22 : vector<64x1xf32>
    %cst_7 = arith.constant 9.99999996E-13 : f32
    %24 = vector.broadcast %cst_7 : f32 to vector<64x1xf32>
    %25 = arith.addf %23, %24 : vector<64x1xf32>
    %26 = math.log %25 : vector<64x1xf32>
    %27 = math.absf %26 : vector<64x1xf32>
    %cst_8 = arith.constant 0.000000e+00 : f32
    %28 = vector.broadcast %cst_8 : f32 to vector<64x1xf32>
    %29 = arith.subf %28, %27 : vector<64x1xf32>
    %30 = vector.shape_cast %29 : vector<64x1xf32> to vector<1x64x1xf32>
    %cst_9 = arith.constant dense<0.000000e+00> : vector<1xf32>
    %31 = vector.multi_reduction <add>, %30, %cst_9 [1, 2] : vector<1x64x1xf32> to vector<1xf32>
    %32 = vector.shape_cast %31 : vector<1xf32> to vector<1x1x1xf32>
    %33 = vector.extract %32[0, 0, 0] : f32 from vector<1x1x1xf32>
    %cst_10 = arith.constant 1.562500e-02 : f32
    %34 = arith.mulf %33, %cst_10 : f32
    %c0_11 = arith.constant 0 : index
    %35 = memref.load %arg2[%c0_11] : memref<1xf32, #tpu.memory_space<smem>>
    memref.store %34, %arg2[%c0_11] : memref<1xf32, #tpu.memory_space<smem>>
    %c32_i32 = arith.constant 32 : i32
    %36 = vector.broadcast %c32_i32 : i32 to vector<64x64xi32>
    %37 = arith.cmpi eq, %1, %36 : vector<64x64xi32>
    %cst_12 = arith.constant 0.000000e+00 : f32
    %38 = vector.broadcast %cst_12 : f32 to vector<64x64xf32>
    %39 = arith.select %37, %0, %38 : vector<64x64xi1>, vector<64x64xf32>
    %cst_13 = arith.constant dense<0.000000e+00> : vector<64xf32>
    %40 = vector.multi_reduction <add>, %39, %cst_13 [1] : vector<64x64xf32> to vector<64xf32>
    %41 = vector.shape_cast %40 : vector<64xf32> to vector<64x1xf32>
    %cst_14 = arith.constant 9.99999996E-13 : f32
    %42 = vector.broadcast %cst_14 : f32 to vector<64x1xf32>
    %43 = arith.addf %41, %42 : vector<64x1xf32>
    %44 = tpu.reciprocal %43 {approx = true} : vector<64x1xf32> -> vector<64x1xf32>
    %45 = vector.broadcast %44 : vector<64x1xf32> to vector<64x64xf32>
    %46 = arith.mulf %0, %45 : vector<64x64xf32>
    %cst_15 = arith.constant 9.99999996E-13 : f32
    %47 = vector.broadcast %cst_15 : f32 to vector<64x64xf32>
    %48 = arith.addf %46, %47 : vector<64x64xf32>
    %49 = math.log %48 : vector<64x64xf32>
    %c1_i32_16 = arith.constant 1 : i32
    %50 = vector.broadcast %c1_i32_16 : i32 to vector<64x64xi32>
    %51 = arith.cmpi sge, %1, %50 : vector<64x64xi32>
    %c32_i32_17 = arith.constant 32 : i32
    %52 = vector.broadcast %c32_i32_17 : i32 to vector<64x64xi32>
    %53 = arith.cmpi slt, %1, %52 : vector<64x64xi32>
    %54 = arith.andi %51, %53 : vector<64x64xi1>
    %cst_18 = arith.constant 0.000000e+00 : f32
    %55 = vector.broadcast %cst_18 : f32 to vector<64x64xf32>
    %56 = arith.select %54, %49, %55 : vector<64x64xi1>, vector<64x64xf32>
    %cst_19 = arith.constant dense<0.000000e+00> : vector<64xf32>
    %57 = vector.multi_reduction <add>, %56, %cst_19 [1] : vector<64x64xf32> to vector<64xf32>
    %58 = vector.shape_cast %57 : vector<64xf32> to vector<64x1xf32>
    %cst_20 = arith.constant -9.99999996E-13 : f32
    %59 = vector.broadcast %cst_20 : f32 to vector<64x1xf32>
    %60 = arith.minimumf %58, %59 : vector<64x1xf32>
    %61 = tpu.reciprocal %60 {approx = true} : vector<64x1xf32> -> vector<64x1xf32>
    %cst_21 = arith.constant -3.200000e+01 : f32
    %62 = vector.broadcast %cst_21 : f32 to vector<64x1xf32>
    %63 = arith.mulf %62, %61 : vector<64x1xf32>
    %c63_i32 = arith.constant 63 : i32
    %64 = vector.broadcast %c63_i32 : i32 to vector<64x64xi32>
    %65 = arith.cmpi eq, %1, %64 : vector<64x64xi32>
    %cst_22 = arith.constant 0.000000e+00 : f32
    %66 = vector.broadcast %cst_22 : f32 to vector<64x64xf32>
    %67 = arith.select %65, %0, %66 : vector<64x64xi1>, vector<64x64xf32>
    %cst_23 = arith.constant dense<0.000000e+00> : vector<64xf32>
    %68 = vector.multi_reduction <add>, %67, %cst_23 [1] : vector<64x64xf32> to vector<64xf32>
    %69 = vector.shape_cast %68 : vector<64xf32> to vector<64x1xf32>
    %cst_24 = arith.constant 9.99999996E-13 : f32
    %70 = vector.broadcast %cst_24 : f32 to vector<64x1xf32>
    %71 = arith.addf %69, %70 : vector<64x1xf32>
    %72 = tpu.reciprocal %71 {approx = true} : vector<64x1xf32> -> vector<64x1xf32>
    %73 = vector.broadcast %72 : vector<64x1xf32> to vector<64x64xf32>
    %74 = arith.mulf %0, %73 : vector<64x64xf32>
    %cst_25 = arith.constant 9.99999996E-13 : f32
    %75 = vector.broadcast %cst_25 : f32 to vector<64x64xf32>
    %76 = arith.addf %74, %75 : vector<64x64xf32>
    %77 = math.log %76 : vector<64x64xf32>
    %c1_i32_26 = arith.constant 1 : i32
    %78 = vector.broadcast %c1_i32_26 : i32 to vector<64x64xi32>
    %79 = arith.cmpi sge, %1, %78 : vector<64x64xi32>
    %c63_i32_27 = arith.constant 63 : i32
    %80 = vector.broadcast %c63_i32_27 : i32 to vector<64x64xi32>
    %81 = arith.cmpi slt, %1, %80 : vector<64x64xi32>
    %82 = arith.andi %79, %81 : vector<64x64xi1>
    %cst_28 = arith.constant 0.000000e+00 : f32
    %83 = vector.broadcast %cst_28 : f32 to vector<64x64xf32>
    %84 = arith.select %82, %77, %83 : vector<64x64xi1>, vector<64x64xf32>
    %cst_29 = arith.constant dense<0.000000e+00> : vector<64xf32>
    %85 = vector.multi_reduction <add>, %84, %cst_29 [1] : vector<64x64xf32> to vector<64xf32>
    %86 = vector.shape_cast %85 : vector<64xf32> to vector<64x1xf32>
    %cst_30 = arith.constant -9.99999996E-13 : f32
    %87 = vector.broadcast %cst_30 : f32 to vector<64x1xf32>
    %88 = arith.minimumf %86, %87 : vector<64x1xf32>
    %89 = tpu.reciprocal %88 {approx = true} : vector<64x1xf32> -> vector<64x1xf32>
    %cst_31 = arith.constant -6.300000e+01 : f32
    %90 = vector.broadcast %cst_31 : f32 to vector<64x1xf32>
    %91 = arith.mulf %90, %89 : vector<64x1xf32>
    %92 = tpu.iota {dimensions = array<i32: 1>} : vector<64x128xi32>
    %c0_i32 = arith.constant 0 : i32
    %93 = vector.broadcast %c0_i32 : i32 to vector<64x128xi32>
    %94 = arith.cmpi eq, %92, %93 : vector<64x128xi32>
    %cst_32 = arith.constant 0.000000e+00 : f32
    %95 = vector.shape_cast %63 : vector<64x1xf32> to vector<64x1xf32>
    %96 = vector.broadcast %95 : vector<64x1xf32> to vector<64x128xf32>
    %97 = vector.broadcast %cst_32 : f32 to vector<64x128xf32>
    %98 = arith.select %94, %96, %97 : vector<64x128xi1>, vector<64x128xf32>
    %c1_i32_33 = arith.constant 1 : i32
    %99 = vector.broadcast %c1_i32_33 : i32 to vector<64x128xi32>
    %100 = arith.cmpi eq, %92, %99 : vector<64x128xi32>
    %101 = vector.shape_cast %91 : vector<64x1xf32> to vector<64x1xf32>
    %102 = vector.broadcast %101 : vector<64x1xf32> to vector<64x128xf32>
    %103 = arith.select %100, %102, %98 : vector<64x128xi1>, vector<64x128xf32>
    %c2_i32 = arith.constant 2 : i32
    %104 = vector.broadcast %c2_i32 : i32 to vector<64x128xi32>
    %105 = arith.cmpi eq, %92, %104 : vector<64x128xi32>
    %106 = vector.shape_cast %29 : vector<64x1xf32> to vector<64x1xf32>
    %107 = vector.broadcast %106 : vector<64x1xf32> to vector<64x128xf32>
    %108 = arith.select %105, %107, %103 : vector<64x128xi1>, vector<64x128xf32>
    %c0_34 = arith.constant 0 : index
    %c0_35 = arith.constant 0 : index
    %109 = vector.load %arg1[%c0_34, %c0_35] : memref<64x128xf32, #tpu.memory_space<vmem>>, vector<64x128xf32>
    tpu.vector_store %arg1[%c0_34, %c0_35], %108 {strides = array<i32>} : memref<64x128xf32, #tpu.memory_space<vmem>>, vector<64x128xf32>,
    return
  }
}

</mosaic_0001>

<bundles_post_ra>
// kernel: neg.2
= control target key start
LH: loop header
LB: loop body
LE: loop exit
PB: predicated region body
PF: predicated region fallthrough
CT: control target
= control target key end

     0   :  { %s136_s0 = inlined_call_operand.vmem [shape: f32[64,64], index: 0, kind: input, shape index: {}]   ;;  %s137_s1 = inlined_call_operand.vmem [shape: f32[64,64], index: 1, kind: output, shape index: {}]  }
   0x1   :  { %v2_v0 = vld [vmem:[%s136_s0] sm:$0xff]  ;;  %v64_v1 = vld [vmem:[%s136_s0 + $0x8] sm:$0xff]  ;;  %v66_v2 = vld [vmem:[%s136_s0 + $0x10] sm:$0xff] }
   0x2   :  { %v5_v3 = vxor.u32 2147483648, %v2_v0  ;;  %v12_v4 = vxor.u32 2147483648, %v64_v1  ;;  %v20_v5 = vxor.u32 2147483648, %v66_v2  ;;  %v68_v6 = vld [vmem:[%s136_s0 + $0x18] sm:$0xff]  ;;  %v70_v7 = vld [vmem:[%s136_s0 + $0x20] sm:$0xff]  ;;  %v72_v8 = vld [vmem:[%s136_s0 + $0x28] sm:$0xff] }
   0x3   :  { %v28_v9 = vxor.u32 2147483648, %v68_v6  ;;  %v36_v10 = vxor.u32 2147483648, %v70_v7  ;;  %v44_v11 = vxor.u32 2147483648, %v72_v8  ;;  %v74_v12 = vld [vmem:[%s136_s0 + $0x30] sm:$0xff]  ;;  %v76_v13 = vld [vmem:[%s136_s0 + $0x38] sm:$0xff] }
   0x4   :  { %7 = vst [vmem:[%s137_s1] sm:$0xff] %v5_v3  ;;  %65 = vst [vmem:[%s137_s1 + $0x8] sm:$0xff] %v12_v4  ;;  %v52_v14 = vxor.u32 2147483648, %v74_v12  ;;  %v60_v15 = vxor.u32 2147483648, %v76_v13 }
   0x5   :  { %67 = vst [vmem:[%s137_s1 + $0x10] sm:$0xff] %v20_v5  ;;  %69 = vst [vmem:[%s137_s1 + $0x18] sm:$0xff] %v28_v9 }
   0x6   :  { %71 = vst [vmem:[%s137_s1 + $0x20] sm:$0xff] %v36_v10  ;;  %73 = vst [vmem:[%s137_s1 + $0x28] sm:$0xff] %v44_v11 }
   0x7   :  { %75 = vst [vmem:[%s137_s1 + $0x30] sm:$0xff] %v52_v14  ;;  %77 = vst [vmem:[%s137_s1 + $0x38] sm:$0xff] %v60_v15 }

// kernel: maeldreg_forward.3
= control target key start
LH: loop header
LB: loop body
LE: loop exit
PB: predicated region body
PF: predicated region fallthrough
CT: control target
= control target key end

     0   :  { %v19_v0 = vlaneseq  ;;  %s1083_s0 = inlined_call_operand.vmem [shape: f32[64,64], index: 0, kind: input, shape index: {}]   ;;  %s1084_s1 = inlined_call_operand.vmem [shape: f32[64,128], index: 1, kind: output, shape index: {0}]   ;;  %s1085_s2 = inlined_call_operand.hbm [shape: f32[1], index: 2, kind: output, shape index: {1}]  }
   0x1   :  { %v690_v1 = vld [vmem:[%s1083_s0 + $0x8] sm:$0xff]  ;;  %v697_v3 = vld [vmem:[%s1083_s0] sm:$0xff] }
   0x2   :  { %v692_v2 = vand.u32 127, %v19_v0 }
   0x3   :  { %8 = vsyncpa [#allocation3], 0  ;;  %vm32_vm0 = vcmask 523264   ;;  %v702_v4 = vld [vmem:[%s1083_s0 + $0x10] sm:$0xff]  ;;  %v730_v12 = vld [vmem:[%s1083_s0 + $0x18] sm:$0xff]  ;;  %vm170_vm7 = vcmask 7168  }
   0x4   :  { %vm65_vm1 = vcmp.eq.s32.totalorder %v692_v2, 20  ;;  %vm21_vm2 = vcmp.ge.s32.totalorder %v692_v2, 1  ;;  %vm22_vm3 = vcmp.lt.s32.totalorder %v692_v2, 20  ;;  %v743_v17 = vld [vmem:[%s1083_s0 + $0x20] sm:$0xff]  ;;  %v756_v22 = vld [vmem:[%s1083_s0 + $0x28] sm:$0xff]  ;;  %v769_v27 = vld [vmem:[%s1083_s0 + $0x30] sm:$0xff] }
   0x5   :  { %v67_v5 = vsel %vm65_vm1, %v690_v1, 0.0  ;;  %v66_v6 = vsel %vm65_vm1, %v697_v3, 0.0  ;;  %vm715_vm4 = vmand %vm21_vm2, %vm22_vm3  ;;  %v68_v21 = vsel %vm65_vm1, %v702_v4, 0.0  ;;  %v69_v26 = vsel %vm65_vm1, %v730_v12, 0.0  ;;  %v782_v32 = vld [vmem:[%s1083_s0 + $0x38] sm:$0xff]  ;;  %s659_s16 = scalar_lea.hbm %s1085_s2, 16 }
   0x6   :  { %v77_v8 = vsel %vm32_vm0, %v67_v5, 0.0  ;;  %v74_v9 = vsel %vm32_vm0, %v66_v6, 0.0  ;;  %v26_v10 = vsel %vm715_vm4, %v702_v4, 0.0  ;;  %v24_v11 = vsel %vm715_vm4, %v697_v3, 0.0  ;;  %p660_p0 = scmp.ne.s32.totalorder %s1085_s2, %s659_s16  ;;  %p663_p1 = scmp.lt.u32.totalorder %s659_s16, %s1085_s2 }
   0x7   :  { %78 = vadd.xlane.f32.xlu0 %v77_v8  ;;  %75 = vadd.xlane.f32.xlu1 %v74_v9  ;;  %v39_v13 = vsel %vm32_vm0, %v26_v10, 0.0  ;;  %v33_v14 = vsel %vm32_vm0, %v24_v11, 0.0  ;;  %v27_v15 = vsel %vm715_vm4, %v730_v12, 0.0  ;;  %v25_v16 = vsel %vm715_vm4, %v690_v1, 0.0 }
   0x8   :  { %v42_v18 = vsel %vm32_vm0, %v27_v15, 0.0  ;;  %v36_v19 = vsel %vm32_vm0, %v25_v16, 0.0  ;;  %v28_v20 = vsel %vm715_vm4, %v743_v17, 0.0  ;;  %v80_v24 = vsel %vm32_vm0, %v68_v21, 0.0  ;;  %p665_p2 = pnand %p663_p1, %p660_p0 }
   0x9   :  { %v45_v23 = vsel %vm32_vm0, %v28_v20, 0.0  ;;  %v29_v25 = vsel %vm715_vm4, %v756_v22, 0.0  ;;  %v83_v29 = vsel %vm32_vm0, %v69_v26, 0.0  ;;  %v30_v30 = vsel %vm715_vm4, %v769_v27, 0.0 }
   0xa   :  { %v48_v28 = vsel %vm32_vm0, %v29_v25, 0.0  ;;  %v70_v31 = vsel %vm65_vm1, %v743_v17, 0.0  ;;  %v51_v33 = vsel %vm32_vm0, %v30_v30, 0.0  ;;  %v31_v35 = vsel %vm715_vm4, %v782_v32, 0.0 }
   0xb   :  { %40 = vadd.xlane.f32.xlu1 %v39_v13  ;;  %34 = vadd.xlane.f32.xlu0 %v33_v14  ;;  %v86_v34 = vsel %vm32_vm0, %v70_v31, 0.0  ;;  %v71_v36 = vsel %vm65_vm1, %v756_v22, 0.0  ;;  %v54_v37 = vsel %vm32_vm0, %v31_v35, 0.0  ;;  %v73_v39 = vsel %vm65_vm1, %v782_v32, 0.0 }
   0xc   :  { %v89_v38 = vsel %vm32_vm0, %v71_v36, 0.0  ;;  %v72_v40 = vsel %vm65_vm1, %v769_v27, 0.0  ;;  %vm198_vm5 = vcmp.eq.s32.totalorder %v692_v2, 32  ;;  %v95_v41 = vsel %vm32_vm0, %v73_v39, 0.0 }
   0xd   :  { %v92_v42 = vsel %vm32_vm0, %v72_v40, 0.0  ;;  %v199_v43 = vsel %vm198_vm5, %v697_v3, 0.0  ;;  %v200_v44 = vsel %vm198_vm5, %v690_v1, 0.0  ;;  %v201_v47 = vsel %vm198_vm5, %v702_v4, 0.0 }
   0xe   :  { %v207_v45 = vsel %vm32_vm0, %v199_v43, 0.0  ;;  %v210_v46 = vsel %vm32_vm0, %v200_v44, 0.0  ;;  %v202_v48 = vsel %vm198_vm5, %v730_v12, 0.0  ;;  %v213_v49 = vsel %vm32_vm0, %v201_v47, 0.0 }
   0xf   :  { %43 = vadd.xlane.f32.xlu1 %v42_v18  ;;  %37 = vadd.xlane.f32.xlu0 %v36_v19  ;;  %v216_v50 = vsel %vm32_vm0, %v202_v48, 0.0  ;;  %v203_v51 = vsel %vm198_vm5, %v743_v17, 0.0  ;;  %v204_v52 = vsel %vm198_vm5, %v756_v22, 0.0  ;;  %v205_v55 = vsel %vm198_vm5, %v769_v27, 0.0 }
  0x10   :  { %v219_v53 = vsel %vm32_vm0, %v203_v51, 0.0  ;;  %v222_v54 = vsel %vm32_vm0, %v204_v52, 0.0  ;;  %v206_v56 = vsel %vm198_vm5, %v782_v32, 0.0  ;;  %vm337_vm6 = vcmp.eq.s32.totalorder %v692_v2, 63 }
  0x11   :  { %v225_v57 = vsel %vm32_vm0, %v205_v55, 0.0  ;;  %v228_v58 = vsel %vm32_vm0, %v206_v56, 0.0  ;;  %v338_v59 = vsel %vm337_vm6, %v697_v3, 0.0  ;;  %v339_v60 = vsel %vm337_vm6, %v690_v1, 0.0 }
  0x12   :  { %v346_v61 = vsel %vm32_vm0, %v338_v59, 0.0  ;;  %v349_v62 = vsel %vm32_vm0, %v339_v60, 0.0  ;;  %v340_v63 = vsel %vm337_vm6, %v702_v4, 0.0  ;;  %v341_v0 = vsel %vm337_vm6, %v730_v12, 0.0 }
  0x13   :  { %46 = vadd.xlane.f32.xlu1 %v45_v23  ;;  %81 = vadd.xlane.f32.xlu0 %v80_v24  ;;  %v352_v5 = vsel %vm32_vm0, %v340_v63, 0.0  ;;  %v355_v6 = vsel %vm32_vm0, %v341_v0, 0.0  ;;  %v342_v7 = vsel %vm337_vm6, %v743_v17, 0.0  ;;  %v343_v8 = vsel %vm337_vm6, %v756_v22, 0.0 }
  0x14   :  { %v358_v9 = vsel %vm32_vm0, %v342_v7, 0.0  ;;  %v361_v10 = vsel %vm32_vm0, %v343_v8, 0.0  ;;  %v344_v11 = vsel %vm337_vm6, %v769_v27, 0.0  ;;  %v345_v13 = vsel %vm337_vm6, %v782_v32, 0.0 }
  0x15   :  { %v364_v14 = vsel %vm32_vm0, %v344_v11, 0.0  ;;  %v367_v15 = vsel %vm32_vm0, %v345_v13, 0.0  ;;  %vm279_vm8 = vcmp.lt.s32.totalorder %v692_v2, 32  ;;  %vm418_vm10 = vcmp.lt.s32.totalorder %v692_v2, 63 }
  0x16   :  { %vm909_vm9 = vmand %vm21_vm2, %vm279_vm8  ;;  %vm476_vm12 = vcmp.eq.s32.totalorder %v692_v2, 0  ;;  %vm485_vm13 = vcmp.eq.s32.totalorder %v692_v2, 1  ;;  %vm494_vm14 = vcmp.eq.s32.totalorder %v692_v2, 2 }
  0x17   :  { %49 = vadd.xlane.f32.xlu1 %v48_v28  ;;  %84 = vadd.xlane.f32.xlu0 %v83_v29  ;;  %vm953_vm11 = vmand %vm21_vm2, %vm418_vm10 }
  0x1b   :  { %52 = vadd.xlane.f32.xlu1 %v51_v33  ;;  %87 = vadd.xlane.f32.xlu0 %v86_v34 }
  0x1f   :  { %55 = vadd.xlane.f32.xlu1 %v54_v37  ;;  %90 = vadd.xlane.f32.xlu0 %v89_v38 }
  0x23   :  { %96 = vadd.xlane.f32.xlu1 %v95_v41  ;;  %93 = vadd.xlane.f32.xlu0 %v92_v42 }
  0x27   :  { %208 = vadd.xlane.f32.xlu0 %v207_v45  ;;  %211 = vadd.xlane.f32.xlu1 %v210_v46 }
  0x2b   :  { %214 = vadd.xlane.f32.xlu0 %v213_v49  ;;  %217 = vadd.xlane.f32.xlu1 %v216_v50 }
  0x2f   :  { %220 = vadd.xlane.f32.xlu0 %v219_v53  ;;  %223 = vadd.xlane.f32.xlu1 %v222_v54 }
  0x33   :  { %226 = vadd.xlane.f32.xlu0 %v225_v57  ;;  %229 = vadd.xlane.f32.xlu1 %v228_v58 }
  0x37   :  { %347 = vadd.xlane.f32.xlu0 %v346_v61  ;;  %350 = vadd.xlane.f32.xlu1 %v349_v62 }
  0x3b   :  { %353 = vadd.xlane.f32.xlu0 %v352_v5  ;;  %356 = vadd.xlane.f32.xlu1 %v355_v6 }
  0x3f   :  { %359 = vadd.xlane.f32.xlu0 %v358_v9  ;;  %362 = vadd.xlane.f32.xlu1 %v361_v10 }
  0x43   :  { %365 = vadd.xlane.f32.xlu0 %v364_v14  ;;  %368 = vadd.xlane.f32.xlu1 %v367_v15 }
  0x94   :  { %v79_v16 = vpop.xlane.xlu0 %78  ;;  %v76_v18 = vpop.xlane.xlu1 %75 }
  0x98   :  { %v41_v19 = vpop.xlane.xlu1 %40  ;;  %v35_v20 = vpop.xlane.xlu0 %34 }
  0x99   :  { %v57_v21 = vmul.f32 0.05263158, %v35_v20  ;;  %v59_v29 = vmul.f32 0.05263158, %v41_v19 }
  0x9b   :  { %v98_v23 = vsub.f32 %v76_v18, %v57_v21 }
  0x9c   :  { %v44_v24 = vpop.xlane.xlu1 %43  ;;  %v38_v25 = vpop.xlane.xlu0 %37 }
  0x9d   :  { %v106_v26 = vmax.f32 %v98_v23, 1e-12  ;;  %v58_v28 = vmul.f32 0.05263158, %v38_v25  ;;  %v60_v36 = vmul.f32 0.05263158, %v44_v24 }
  0x9f   :  { %531 = vrcp.f32 %v106_v26  ;;  %v99_v30 = vsub.f32 %v79_v16, %v58_v28 }
  0xa0   :  { %v47_v31 = vpop.xlane.xlu1 %46  ;;  %v82_v33 = vpop.xlane.xlu0 %81 }
  0xa1   :  { %v107_v34 = vmax.f32 %v99_v30, 1e-12  ;;  %v100_v35 = vsub.f32 %v82_v33, %v59_v29  ;;  %v61_v41 = vmul.f32 0.05263158, %v47_v31 }
  0xa3   :  { %533 = vrcp.f32 %v107_v34  ;;  %v108_v37 = vmax.f32 %v100_v35, 1e-12 }
  0xa4   :  { %v50_v38 = vpop.xlane.xlu1 %49  ;;  %v85_v39 = vpop.xlane.xlu0 %84 }
  0xa5   :  { %535 = vrcp.f32 %v108_v37  ;;  %v101_v40 = vsub.f32 %v85_v39, %v60_v36  ;;  %v62_v48 = vmul.f32 0.05263158, %v50_v38 }
  0xa7   :  { %v109_v42 = vmax.f32 %v101_v40, 1e-12 }
  0xa8   :  { %v53_v43 = vpop.xlane.xlu1 %52  ;;  %v88_v44 = vpop.xlane.xlu0 %87 }
  0xa9   :  { %v532_v45 = vpop.eup %531  ;;  %537 = vrcp.f32 %v109_v42  ;;  %v102_v46 = vsub.f32 %v88_v44, %v61_v41  ;;  %v870_v58 = vmul.f32 0.05263158, %v53_v43 }
  0xaa   :  { %v122_v47 = vmul.f32 %v532_v45, %v57_v21 }
  0xab   :  { %v110_v49 = vmax.f32 %v102_v46, 1e-12 }
  0xac   :  { %v130_v50 = vadd.f32 1e-12, %v122_v47  ;;  %v56_v51 = vpop.xlane.xlu1 %55  ;;  %v91_v52 = vpop.xlane.xlu0 %90 }
  0xad   :  { %v534_v53 = vpop.eup %533  ;;  %539 = vrcp.f32 %v110_v49  ;;  %v868_v54 = vmul.f32 0.05263158, %v56_v51  ;;  %v103_v55 = vsub.f32 %v91_v52, %v62_v48 }
  0xae   :  { %541 = vlog2.f32 %v130_v50  ;;  %v123_v56 = vmul.f32 %v534_v53, %v58_v28 }
  0xaf   :  { %v536_v57 = vpop.eup %535  ;;  %v111_v59 = vmax.f32 %v103_v55, 1e-12 }
  0xb0   :  { %v131_v60 = vadd.f32 1e-12, %v123_v56  ;;  %v124_v61 = vmul.f32 %v536_v57, %v59_v29  ;;  %v97_v62 = vpop.xlane.xlu1 %96  ;;  %v94_v63 = vpop.xlane.xlu0 %93 }
  0xb1   :  { %543 = vrcp.f32 %v111_v59  ;;  %v105_v0 = vsub.f32 %v97_v62, %v868_v54  ;;  %v104_v5 = vsub.f32 %v94_v63, %v870_v58 }
  0xb2   :  { %545 = vlog2.f32 %v131_v60  ;;  %v132_v6 = vadd.f32 1e-12, %v124_v61 }
  0xb3   :  { %v538_v7 = vpop.eup %537  ;;  %v113_v8 = vmax.f32 %v105_v0, 1e-12  ;;  %v112_v9 = vmax.f32 %v104_v5, 1e-12 }
  0xb4   :  { %547 = vlog2.f32 %v132_v6  ;;  %v125_v10 = vmul.f32 %v538_v7, %v60_v36  ;;  %v209_v11 = vpop.xlane.xlu0 %208  ;;  %v212_v13 = vpop.xlane.xlu1 %211 }
  0xb5   :  { %549 = vrcp.f32 %v113_v8  ;;  %v231_v14 = vadd.f32 1e-12, %v209_v11  ;;  %v232_v15 = vadd.f32 1e-12, %v212_v13 }
  0xb6   :  { %v133_v16 = vadd.f32 1e-12, %v125_v10  ;;  %551 = vrcp.f32 %v112_v9 }
  0xb7   :  { %v540_v18 = vpop.eup %539  ;;  %553 = vrcp.f32 %v231_v14 }
  0xb8   :  { %v542_v19 = vpop.eup %541  ;;  %555 = vlog2.f32 %v133_v16  ;;  %v126_v20 = vmul.f32 %v540_v18, %v61_v41  ;;  %v215_v21 = vpop.xlane.xlu0 %214 }
  0xb9   :  { %v218_v23 = vpop.xlane.xlu1 %217  ;;  %v139_v24 = vmul.f32 0.6931472, %v542_v19  ;;  %v233_v25 = vadd.f32 1e-12, %v215_v21  ;;  %557 = vrcp.f32 %v232_v15 }
  0xba   :  { %v234_v26 = vadd.f32 1e-12, %v218_v23  ;;  %v134_v28 = vadd.f32 1e-12, %v126_v20 }
  0xbb   :  { %v544_v29 = vpop.eup %543  ;;  %v154_v30 = vand.u32 2147483647, %v139_v24  ;;  %559 = vrcp.f32 %v233_v25 }
  0xbc   :  { %v546_v31 = vpop.eup %545  ;;  %561 = vlog2.f32 %v134_v28  ;;  %v127_v33 = vmul.f32 %v544_v29, %v62_v48  ;;  %v221_v34 = vpop.xlane.xlu0 %220 }
  0xbd   :  { %v224_v35 = vpop.xlane.xlu1 %223  ;;  %v141_v36 = vmul.f32 0.6931472, %v546_v31  ;;  %v235_v37 = vadd.f32 1e-12, %v221_v34  ;;  %563 = vrcp.f32 %v234_v26  ;;  %v874_v39 = vsub.f32 0.0, %v154_v30 }
  0xbe   :  { %v548_v38 = vpop.eup %547  ;;  %v236_v40 = vadd.f32 1e-12, %v224_v35  ;;  %v135_v41 = vadd.f32 1e-12, %v127_v33 }
  0xbf   :  { %v550_v42 = vpop.eup %549  ;;  %v155_v43 = vand.u32 2147483647, %v141_v36  ;;  %565 = vrcp.f32 %v235_v37  ;;  %v143_v44 = vmul.f32 0.6931472, %v548_v38  ;;  %v171_v56 = vsel %vm170_vm7, %v874_v39, 0.0 }
  0xc0   :  { %v552_v45 = vpop.eup %551  ;;  %v227_v46 = vpop.xlane.xlu0 %226  ;;  %567 = vrcp.f32 %v236_v40  ;;  %v129_v48 = vmul.f32 %v550_v42, %v868_v54 }
  0xc1   :  { %v230_v47 = vpop.xlane.xlu1 %229  ;;  %v554_v49 = vpop.eup %553  ;;  %v877_v50 = vsub.f32 0.0, %v155_v43  ;;  %v237_v51 = vadd.f32 1e-12, %v227_v46  ;;  %v128_v53 = vmul.f32 %v552_v45, %v870_v58  ;;  %569 = vlog2.f32 %v135_v41 }
  0xc2   :  { %v238_v52 = vadd.f32 1e-12, %v230_v47  ;;  %v556_v55 = vpop.eup %555  ;;  %v247_v57 = vmul.f32 %v554_v49, %v697_v3  ;;  %v156_v59 = vand.u32 2147483647, %v143_v44  ;;  %v137_v58 = vadd.f32 1e-12, %v129_v48 }
  0xc3   :  { %v558_v60 = vpop.eup %557  ;;  %v172_v61 = vsel %vm170_vm7, %v877_v50, 0.0  ;;  %571 = vrcp.f32 %v237_v51  ;;  %v136_v54 = vadd.f32 1e-12, %v128_v53  ;;  %v145_v62 = vmul.f32 0.6931472, %v556_v55 }
  0xc4   :  { %v348_v63 = vpop.xlane.xlu0 %347  ;;  %573 = vrcp.f32 %v238_v52  ;;  %v255_v5 = vadd.f32 1e-12, %v247_v57  ;;  %v885_v6 = vsub.f32 0.0, %v156_v59  ;;  %v173_v13 = vadd.f32 %v172_v61, %v171_v56 }
  0xc5   :  { %v351_v0 = vpop.xlane.xlu1 %350  ;;  %v560_v7 = vpop.eup %559  ;;  %v370_v8 = vadd.f32 1e-12, %v348_v63  ;;  %575 = vlog2.f32 %v136_v54  ;;  %v157_v10 = vand.u32 2147483647, %v145_v62  ;;  %v248_v15 = vmul.f32 %v558_v60, %v690_v1 }
  0xc6   :  { %v371_v9 = vadd.f32 1e-12, %v351_v0  ;;  %v562_v11 = vpop.eup %561  ;;  %577 = vlog2.f32 %v255_v5  ;;  %v249_v14 = vmul.f32 %v560_v7, %v702_v4  ;;  %v174_v20 = vsel %vm170_vm7, %v885_v6, 0.0 }
  0xc7   :  { %v564_v16 = vpop.eup %563  ;;  %579 = vrcp.f32 %v370_v8  ;;  %v147_v18 = vmul.f32 0.6931472, %v562_v11  ;;  %v889_v19 = vsub.f32 0.0, %v157_v10  ;;  %v256_v25 = vadd.f32 1e-12, %v248_v15 }
  0xc8   :  { %v354_v21 = vpop.xlane.xlu0 %353  ;;  %581 = vrcp.f32 %v371_v9  ;;  %v257_v24 = vadd.f32 1e-12, %v249_v14  ;;  %v250_v26 = vmul.f32 %v564_v16, %v730_v12  ;;  %v175_v42 = vadd.f32 %v174_v20, %v173_v13 }
  0xc9   :  { %v357_v23 = vpop.xlane.xlu1 %356  ;;  %v566_v28 = vpop.eup %565  ;;  %v372_v29 = vadd.f32 1e-12, %v354_v21  ;;  %583 = vlog2.f32 %v137_v58  ;;  %v158_v31 = vand.u32 2147483647, %v147_v18  ;;  %v176_v36 = vsel %vm170_vm7, %v889_v19, 0.0 }
  0xca   :  { %v373_v30 = vadd.f32 1e-12, %v357_v23  ;;  %v568_v33 = vpop.eup %567  ;;  %585 = vlog2.f32 %v257_v24  ;;  %v251_v34 = vmul.f32 %v566_v28, %v743_v17  ;;  %v258_v44 = vadd.f32 1e-12, %v250_v26 }
  0xcb   :  { %587 = vrcp.f32 %v372_v29  ;;  %v896_v35 = vsub.f32 0.0, %v158_v31  ;;  %v252_v37 = vmul.f32 %v568_v33, %v756_v22  ;;  %v570_v38 = vpop.eup %569  ;;  %v177_v51 = vadd.f32 %v176_v36, %v175_v42 }
  0xcc   :  { %v360_v40 = vpop.xlane.xlu0 %359  ;;  %589 = vrcp.f32 %v373_v30  ;;  %v259_v43 = vadd.f32 1e-12, %v251_v34  ;;  %v149_v48 = vmul.f32 0.6931472, %v570_v38 }
  0xcd   :  { %v363_v41 = vpop.xlane.xlu1 %362  ;;  %v572_v45 = vpop.eup %571  ;;  %v374_v46 = vadd.f32 1e-12, %v360_v40  ;;  %591 = vlog2.f32 %v256_v25  ;;  %v178_v52 = vsel %vm170_vm7, %v896_v35, 0.0  ;;  %v260_v57 = vadd.f32 1e-12, %v252_v37 }
  0xce   :  { %v375_v47 = vadd.f32 1e-12, %v363_v41  ;;  %v574_v49 = vpop.eup %573  ;;  %593 = vlog2.f32 %v259_v43  ;;  %v253_v53 = vmul.f32 %v572_v45, %v769_v27  ;;  %v159_v56 = vand.u32 2147483647, %v149_v48 }
  0xcf   :  { %v576_v55 = vpop.eup %575  ;;  %595 = vrcp.f32 %v374_v46  ;;  %v254_v59 = vmul.f32 %v574_v49, %v782_v32  ;;  %v179_v0 = vadd.f32 %v178_v52, %v177_v51 }
  0xd0   :  { %v578_v60 = vpop.eup %577  ;;  %v366_v61 = vpop.xlane.xlu0 %365  ;;  %597 = vrcp.f32 %v375_v47  ;;  %v151_v63 = vmul.f32 0.6931472, %v576_v55  ;;  %v261_v5 = vadd.f32 1e-12, %v253_v53  ;;  %v913_v13 = vsub.f32 0.0, %v159_v56 }
  0xd1   :  { %v369_v62 = vpop.xlane.xlu1 %368  ;;  %v580_v58 = vpop.eup %579  ;;  %v376_v7 = vadd.f32 1e-12, %v366_v61  ;;  %v264_v8 = vmul.f32 0.6931472, %v578_v60  ;;  %599 = vlog2.f32 %v258_v44  ;;  %v262_v18 = vadd.f32 1e-12, %v254_v59 }
  0xd2   :  { %v377_v9 = vadd.f32 1e-12, %v369_v62  ;;  %v582_v10 = vpop.eup %581  ;;  %v160_v11 = vand.u32 2147483647, %v151_v63  ;;  %601 = vlog2.f32 %v261_v5  ;;  %v386_v14 = vmul.f32 %v580_v58, %v697_v3 }
  0xd3   :  { %v584_v15 = vpop.eup %583  ;;  %603 = vrcp.f32 %v376_v7  ;;  %v281_v16 = vsel %vm909_vm9, %v264_v8, 0.0  ;;  %v387_v20 = vmul.f32 %v582_v10, %v690_v1  ;;  %v180_v3 = vsel %vm170_vm7, %v913_v13, 0.0 }
  0xd4   :  { %v586_v21 = vpop.eup %585  ;;  %v289_v23 = vsel %vm32_vm0, %v281_v16, 0.0  ;;  %605 = vrcp.f32 %v377_v9  ;;  %v153_v24 = vmul.f32 0.6931472, %v584_v15  ;;  %v920_v25 = vsub.f32 0.0, %v160_v11 }
  0xd5   :  { %v588_v26 = vpop.eup %587  ;;  %290 = vadd.xlane.f32.xlu1 %v289_v23  ;;  %v268_v28 = vmul.f32 0.6931472, %v586_v21  ;;  %v394_v29 = vadd.f32 1e-12, %v386_v14  ;;  %607 = vlog2.f32 %v260_v57  ;;  %v181_v33 = vadd.f32 %v180_v3, %v179_v0 }
  0xd6   :  { %v590_v30 = vpop.eup %589  ;;  %v161_v31 = vand.u32 2147483647, %v153_v24  ;;  %v182_v1 = vsel %vm170_vm7, %v920_v25, 0.0  ;;  %v388_v34 = vmul.f32 %v588_v26, %v702_v4  ;;  %v395_v38 = vadd.f32 1e-12, %v387_v20 }
  0xd7   :  { %v592_v36 = vpop.eup %591  ;;  %v283_v37 = vsel %vm909_vm9, %v268_v28, 0.0  ;;  %609 = vlog2.f32 %v394_v29  ;;  %v389_v40 = vmul.f32 %v590_v30, %v730_v12  ;;  %v183_v44 = vadd.f32 %v182_v1, %v181_v33 }
  0xd8   :  { %v594_v41 = vpop.eup %593  ;;  %v295_v42 = vsel %vm32_vm0, %v283_v37, 0.0  ;;  %v931_v43 = vsub.f32 0.0, %v161_v31  ;;  %v266_v45 = vmul.f32 0.6931472, %v592_v36  ;;  %v396_v48 = vadd.f32 1e-12, %v388_v34 }
  0xd9   :  { %v596_v46 = vpop.eup %595  ;;  %296 = vadd.xlane.f32.xlu1 %v295_v42  ;;  %v272_v47 = vmul.f32 0.6931472, %v594_v41  ;;  %611 = vlog2.f32 %v262_v18  ;;  %v397_v4 = vadd.f32 1e-12, %v389_v40 }
  0xda   :  { %v598_v49 = vpop.eup %597  ;;  %v184_v51 = vsel %vm170_vm7, %v931_v43, 0.0  ;;  %v390_v52 = vmul.f32 %v596_v46, %v743_v17  ;;  %613 = vlog2.f32 %v395_v38  ;;  %v282_v56 = vsel %vm909_vm9, %v266_v45, 0.0 }
  0xdb   :  { %v600_v12 = vpop.eup %599  ;;  %v185_v53 = vadd.f32 %v184_v51, %v183_v44  ;;  %v285_v55 = vsel %vm909_vm9, %v272_v47, 0.0  ;;  %615 = vlog2.f32 %v396_v48  ;;  %v391_v17 = vmul.f32 %v598_v49, %v756_v22 }
  0xdc   :  { %v602_v57 = vpop.eup %601  ;;  %v301_v59 = vsel %vm32_vm0, %v285_v55, 0.0  ;;  %v270_v60 = vmul.f32 0.6931472, %v600_v12  ;;  %v398_v61 = vadd.f32 1e-12, %v390_v52  ;;  %617 = vlog2.f32 %v397_v4 }
  0xdd   :  { %v604_v62 = vpop.eup %603  ;;  %186 = vadd.xlane.f32.xlu0 %v185_v53  ;;  %302 = vadd.xlane.f32.xlu1 %v301_v59  ;;  %v276_v63 = vmul.f32 0.6931472, %v602_v57  ;;  %v292_v5 = vsel %vm32_vm0, %v282_v56, 0.0  ;;  %v399_v10 = vadd.f32 1e-12, %v391_v17 }
  0xde   :  { %v606_v0 = vpop.eup %605  ;;  %619 = vlog2.f32 %v398_v61  ;;  %v392_v58 = vmul.f32 %v604_v62, %v769_v27  ;;  %v284_v9 = vsel %vm909_vm9, %v270_v60, 0.0 }
  0xdf   :  { %v608_v7 = vpop.eup %607  ;;  %v287_v8 = vsel %vm909_vm9, %v276_v63, 0.0  ;;  %v393_v11 = vmul.f32 %v606_v0, %v782_v32  ;;  %621 = vlog2.f32 %v399_v10  ;;  %v298_v18 = vsel %vm32_vm0, %v284_v9, 0.0 }
  0xe0   :  { %v307_v22 = vsel %vm32_vm0, %v287_v8, 0.0  ;;  %v274_v14 = vmul.f32 0.6931472, %v608_v7  ;;  %v400_v15 = vadd.f32 1e-12, %v392_v58 }
  0xe1   :  { %v610_v16 = vpop.eup %609  ;;  %293 = vadd.xlane.f32.xlu0 %v292_v5  ;;  %308 = vadd.xlane.f32.xlu1 %v307_v22  ;;  %v401_v21 = vadd.f32 1e-12, %v393_v11 }
  0xe2   :  { %v403_v20 = vmul.f32 0.6931472, %v610_v16  ;;  %623 = vlog2.f32 %v400_v15  ;;  %v286_v23 = vsel %vm909_vm9, %v274_v14, 0.0 }
  0xe3   :  { %v612_v32 = vpop.eup %611  ;;  %v304_v30 = vsel %vm32_vm0, %v286_v23, 0.0  ;;  %625 = vlog2.f32 %v401_v21 }
  0xe4   :  { %v614_v24 = vpop.eup %613  ;;  %v420_v26 = vsel %vm953_vm11, %v403_v20, 0.0  ;;  %v278_v28 = vmul.f32 0.6931472, %v612_v32 }
  0xe5   :  { %v616_v3 = vpop.eup %615  ;;  %299 = vadd.xlane.f32.xlu0 %v298_v18  ;;  %v428_v29 = vsel %vm32_vm0, %v420_v26, 0.0  ;;  %v405_v34 = vmul.f32 0.6931472, %v614_v24 }
  0xe6   :  { %429 = vadd.xlane.f32.xlu1 %v428_v29  ;;  %v407_v31 = vmul.f32 0.6931472, %v616_v3  ;;  %v618_v33 = vpop.eup %617  ;;  %v288_v1 = vsel %vm909_vm9, %v278_v28, 0.0 }
  0xe7   :  { %v310_v41 = vsel %vm32_vm0, %v288_v1, 0.0  ;;  %v421_v54 = vsel %vm953_vm11, %v405_v34, 0.0  ;;  %v409_v45 = vmul.f32 0.6931472, %v618_v33 }
  0xe8   :  { %v620_v36 = vpop.eup %619  ;;  %v422_v37 = vsel %vm953_vm11, %v407_v31, 0.0  ;;  %v431_v4 = vsel %vm32_vm0, %v421_v54, 0.0 }
  0xe9   :  { %305 = vadd.xlane.f32.xlu0 %v304_v30  ;;  %v434_v38 = vsel %vm32_vm0, %v422_v37, 0.0  ;;  %v411_v40 = vmul.f32 0.6931472, %v620_v36  ;;  %v622_v42 = vpop.eup %621  ;;  %v423_v51 = vsel %vm953_vm11, %v409_v45, 0.0 }
  0xea   :  { %435 = vadd.xlane.f32.xlu1 %v434_v38  ;;  %v413_v52 = vmul.f32 0.6931472, %v622_v42  ;;  %v437_v55 = vsel %vm32_vm0, %v423_v51, 0.0 }
  0xeb   :  { %v424_v44 = vsel %vm953_vm11, %v411_v40, 0.0 }
  0xec   :  { %v624_v46 = vpop.eup %623  ;;  %v440_v47 = vsel %vm32_vm0, %v424_v44, 0.0  ;;  %v425_v56 = vsel %vm953_vm11, %v413_v52, 0.0 }
  0xed   :  { %311 = vadd.xlane.f32.xlu0 %v310_v41  ;;  %v415_v48 = vmul.f32 0.6931472, %v624_v46  ;;  %v626_v12 = vpop.eup %625  ;;  %v443_v59 = vsel %vm32_vm0, %v425_v56, 0.0 }
  0xee   :  { %441 = vadd.xlane.f32.xlu1 %v440_v47  ;;  %v417_v57 = vmul.f32 0.6931472, %v626_v12 }
  0xef   :  { %v426_v49 = vsel %vm953_vm11, %v415_v48, 0.0 }
  0xf0   :  { %v446_v53 = vsel %vm32_vm0, %v426_v49, 0.0  ;;  %v427_v60 = vsel %vm953_vm11, %v417_v57, 0.0 }
  0xf1   :  { %432 = vadd.xlane.f32.xlu0 %v431_v4  ;;  %v449_v61 = vsel %vm32_vm0, %v427_v60, 0.0 }
  0xf2   :  { %447 = vadd.xlane.f32.xlu1 %v446_v53 }
  0xf5   :  { %438 = vadd.xlane.f32.xlu0 %v437_v55 }
  0xf9   :  { %444 = vadd.xlane.f32.xlu0 %v443_v59 }
  0xfd   :  { %450 = vadd.xlane.f32.xlu0 %v449_v61 }
 0x162   :  { %v291_v62 = vpop.xlane.xlu1 %290 }
 0x163   :  { %v313_v5 = vmin.f32 %v291_v62, -1e-12 }
 0x165   :  { %627 = vrcp.f32 %v313_v5 }
 0x166   :  { %v297_v63 = vpop.xlane.xlu1 %296 }
 0x167   :  { %v315_v10 = vmin.f32 %v297_v63, -1e-12 }
 0x169   :  { %629 = vrcp.f32 %v315_v10 }
 0x16a   :  { %v187_v17 = vpop.xlane.xlu0 %186  ;;  %v303_v0 = vpop.xlane.xlu1 %302 }
 0x16b   :  { %v188_v58 = vrot.slane %v187_v17, 4  ;;  %v317_v15 = vmin.f32 %v303_v0, -1e-12 }
 0x16d   :  { %v189_v7 = vadd.f32 %v188_v58, %v187_v17 }
 0x16e   :  { %v294_v8 = vpop.xlane.xlu0 %293  ;;  %v309_v9 = vpop.xlane.xlu1 %308 }
 0x16f   :  { %v190_v11 = vrot.slane %v189_v7, 2  ;;  %v314_v20 = vmin.f32 %v294_v8, -1e-12  ;;  %v319_v23 = vmin.f32 %v309_v9, -1e-12  ;;  %v628_v28 = vpop.eup %627 }
 0x170   :  { %v329_v31 = vmul.f32 -32.0, %v628_v28 }
 0x171   :  { %v191_v22 = vadd.f32 %v190_v11, %v189_v7 }
 0x172   :  { %v300_v14 = vpop.xlane.xlu0 %299  ;;  %v477_v41 = vsel %vm476_vm12, %v329_v31, 0.0 }
 0x173   :  { %v430_v16 = vpop.xlane.xlu1 %429  ;;  %v192_v27 = vrot.slane %v191_v22, 1  ;;  %v316_v3 = vmin.f32 %v300_v14, -1e-12  ;;  %v630_v34 = vpop.eup %629 }
 0x174   :  { %v452_v18 = vmin.f32 %v430_v16, -1e-12  ;;  %v331_v42 = vmul.f32 -32.0, %v630_v34 }
 0x175   :  { %v193_v21 = vadd.f32 %v192_v27, %v191_v22 }
 0x176   :  { %631 = vrcp.f32 %v452_v18  ;;  %v306_v32 = vpop.xlane.xlu0 %305  ;;  %v479_v52 = vsel %vm476_vm12, %v331_v42, 0.0 }
 0x177   :  { %633 = vrcp.f32 %v317_v15  ;;  %528 = vpush %v193_v21  ;;  %v436_v24 = vpop.xlane.xlu1 %435  ;;  %v318_v33 = vmin.f32 %v306_v32, -1e-12 }
 0x178   :  { %v454_v26 = vmin.f32 %v436_v24, -1e-12  ;;  %635 = vrcp.f32 %v314_v20 }
 0x17a   :  { %637 = vrcp.f32 %v454_v26  ;;  %v312_v29 = vpop.xlane.xlu0 %311 }
 0x17b   :  { %639 = vrcp.f32 %v319_v23  ;;  %v442_v30 = vpop.xlane.xlu1 %441  ;;  %v320_v46 = vmin.f32 %v312_v29, -1e-12 }
 0x17c   :  { %v456_v1 = vmin.f32 %v442_v30, -1e-12  ;;  %641 = vrcp.f32 %v316_v3 }
 0x17e   :  { %643 = vrcp.f32 %v456_v1  ;;  %v433_v36 = vpop.xlane.xlu0 %432 }
 0x17f   :  { %v453_v37 = vmin.f32 %v433_v36, -1e-12  ;;  %v448_v38 = vpop.xlane.xlu1 %447  ;;  %645 = vrcp.f32 %v318_v33 }
 0x180   :  { %v632_v40 = vpop.eup %631  ;;  %v458_v44 = vmin.f32 %v448_v38, -1e-12 }
 0x181   :  { %v634_v54 = vpop.eup %633  ;;  %v468_v45 = vmul.f32 -63.0, %v632_v40  ;;  %647 = vrcp.f32 %v453_v37 }
 0x182   :  { %649 = vrcp.f32 %v458_v44  ;;  %v439_v47 = vpop.xlane.xlu0 %438  ;;  %v636_v48 = vpop.eup %635  ;;  %v333_v12 = vmul.f32 -32.0, %v634_v54 }
 0x183   :  { %v486_v4 = vsel %vm485_vm13, %v468_v45, %v477_v41  ;;  %v455_v49 = vmin.f32 %v439_v47, -1e-12  ;;  %v330_v60 = vmul.f32 -32.0, %v636_v48 }
 0x184   :  { %v638_v51 = vpop.eup %637  ;;  %v495_v53 = vsel %vm494_vm14, %v874_v39, %v486_v4  ;;  %v481_v17 = vsel %vm476_vm12, %v333_v12, 0.0 }
 0x185   :  { %v640_v55 = vpop.eup %639  ;;  %503 = vst [vmem:[%s1084_s1] sm:$0xff] %v495_v53  ;;  %v470_v56 = vmul.f32 -63.0, %v638_v51  ;;  %651 = vrcp.f32 %v455_v49  ;;  %v478_v9 = vsel %vm476_vm12, %v330_v60, 0.0 }
 0x186   :  { %653 = vrcp.f32 %v320_v46  ;;  %v445_v57 = vpop.xlane.xlu0 %444  ;;  %v642_v59 = vpop.eup %641  ;;  %v335_v39 = vmul.f32 -32.0, %v640_v55 }
 0x187   :  { %v488_v61 = vsel %vm485_vm13, %v470_v56, %v479_v52  ;;  %v457_v62 = vmin.f32 %v445_v57, -1e-12  ;;  %v332_v10 = vmul.f32 -32.0, %v642_v59 }
 0x188   :  { %v644_v63 = vpop.eup %643  ;;  %v497_v0 = vsel %vm494_vm14, %v885_v6, %v488_v61  ;;  %v483_v6 = vsel %vm476_vm12, %v335_v39, 0.0 }
 0x189   :  { %505 = vst [vmem:[%s1084_s1 + $0x10] sm:$0xff] %v497_v0  ;;  %v472_v5 = vmul.f32 -63.0, %v644_v63  ;;  %655 = vrcp.f32 %v457_v62  ;;  %v646_v58 = vpop.eup %645  ;;  %v480_v21 = vsel %vm476_vm12, %v332_v10, 0.0 }
 0x18a   :  { %v451_v7 = vpop.xlane.xlu0 %450  ;;  %v334_v32 = vmul.f32 -32.0, %v646_v58 }
 0x18b   :  { %v648_v8 = vpop.eup %647  ;;  %v490_v11 = vsel %vm485_vm13, %v472_v5, %v481_v17  ;;  %v459_v22 = vmin.f32 %v451_v7, -1e-12 }
 0x18c   :  { %v650_v14 = vpop.eup %649  ;;  %v499_v15 = vsel %vm494_vm14, %v896_v35, %v490_v11  ;;  %v469_v16 = vmul.f32 -63.0, %v648_v8  ;;  %v482_v29 = vsel %vm476_vm12, %v334_v32, 0.0 }
 0x18d   :  { %507 = vst [vmem:[%s1084_s1 + $0x20] sm:$0xff] %v499_v15  ;;  %v474_v27 = vmul.f32 -63.0, %v650_v14  ;;  %657 = vrcp.f32 %v459_v22 }
 0x18e   :  { %v487_v18 = vsel %vm485_vm13, %v469_v16, %v478_v9 }
 0x18f   :  { %v652_v20 = vpop.eup %651  ;;  %v496_v23 = vsel %vm494_vm14, %v877_v50, %v487_v18  ;;  %v492_v35 = vsel %vm485_vm13, %v474_v27, %v483_v6 }
 0x190   :  { %v654_v24 = vpop.eup %653  ;;  %504 = vst [vmem:[%s1084_s1 + $0x8] sm:$0xff] %v496_v23  ;;  %v501_v26 = vsel %vm494_vm14, %v920_v25, %v492_v35  ;;  %v471_v28 = vmul.f32 -63.0, %v652_v20 }
 0x191   :  { %509 = vst [vmem:[%s1084_s1 + $0x30] sm:$0xff] %v501_v26  ;;  %v336_v30 = vmul.f32 -32.0, %v654_v24 }
 0x192   :  { %v489_v50 = vsel %vm485_vm13, %v471_v28, %v480_v21 }
 0x193   :  { %v656_v3 = vpop.eup %655  ;;  %v498_v31 = vsel %vm494_vm14, %v889_v19, %v489_v50  ;;  %v484_v34 = vsel %vm476_vm12, %v336_v30, 0.0 }
 0x194   :  { %506 = vst [vmem:[%s1084_s1 + $0x18] sm:$0xff] %v498_v31  ;;  %v473_v25 = vmul.f32 -63.0, %v656_v3 }
 0x196   :  { %v491_v33 = vsel %vm485_vm13, %v473_v25, %v482_v29 }
 0x197   :  { %v658_v1 = vpop.eup %657  ;;  %v500_v36 = vsel %vm494_vm14, %v913_v13, %v491_v33 }
 0x198   :  { %508 = vst [vmem:[%s1084_s1 + $0x28] sm:$0xff] %v500_v36  ;;  %v475_v19 = vmul.f32 -63.0, %v658_v1 }
 0x19a   :  { %v493_v37 = vsel %vm485_vm13, %v475_v19, %v484_v34 }
 0x19b   :  { %v502_v38 = vsel %vm494_vm14, %v931_v43, %v493_v37 }
 0x19c   :  { %510 = vst [vmem:[%s1084_s1 + $0x38] sm:$0xff] %v502_v38 }
 0x1a8   :  { %s529_s12 = spop %528 }
 0x1a9   :  { %s195_s13 = smul.f32 0.015625, %s529_s12 }
 0x1ab   :  { %197 = sst [smem:[#allocation2]] %s195_s13 }
 0x1ac   :  { %668 = shalt.err (!%p665_p2)
}
 0x1ad   :  { %s671_s21 = smov [#allocation2]  }
 0x1ae   :  { %520 = dma.smem_to_hbm %s671_s21, 16, %s1085_s2, [#allocation3]  }
 0x1af   :  { %669 = dma.done.wait [#allocation3], 16  }
 0x1b0   :  { %670 = vsyncadd [#allocation3], 4294967280 }
 0x1b1   :  { %526 = sfence }
 0x1b2   :  { %527 = vsyncpa [#allocation3], 1 }

// kernel: maeldreg_forward.2
= control target key start
LH: loop header
LB: loop body
LE: loop exit
PB: predicated region body
PF: predicated region fallthrough
CT: control target
= control target key end

     0   :  { %v1221_v3 = vmov 0.0|0.0   ;;  %vm60_vm0 = vcmask 523264   ;;  %s1922_s0 = inlined_call_operand.vmem [shape: s32[64,1], index: 0, kind: input, shape index: {}]   ;;  %s1923_s1 = inlined_call_operand.vmem [shape: f32[64,192], index: 1, kind: input, shape index: {}]   ;;  %s1924_s2 = inlined_call_operand.vmem [shape: f32[192,128], index: 2, kind: input, shape index: {}]   ;;  %s1925_s3 = inlined_call_operand.vmem [shape: f32[128,16], index: 3, kind: input, shape index: {}]   ;;  %s1926_s4 = inlined_call_operand.vmem [shape: f32[64,64], index: 4, kind: output, shape index: {0}]   ;;  %s1927_s5 = inlined_call_operand.vmem [shape: f32[3], index: 5, kind: output, shape index: {1}]  }
   0x1   :  { %v36_v0 = vld [vmem:[%s1924_s2] sm:$0xff]  ;;  %v37_v1 = vld [vmem:[%s1924_s2 + $0x8] sm:$0xff]  ;;  %v38_v2 = vld [vmem:[%s1924_s2 + $0x10] sm:$0xff]  ;;  %1063 = vmatprep.subr.bf16.mxu0 %v1221_v3 }
   0x2   :  { %v1064_v4 = vpack.c.bf16 %v37_v1, %v36_v0  ;;  %v39_v5 = vld [vmem:[%s1924_s2 + $0x18] sm:$0xff]  ;;  %v40_v7 = vld [vmem:[%s1924_s2 + $0x20] sm:$0xff]  ;;  %v41_v8 = vld [vmem:[%s1924_s2 + $0x28] sm:$0xff] }
   0x3   :  { %v1067_v6 = vpack.c.bf16 %v39_v5, %v38_v2  ;;  %v1070_v9 = vpack.c.bf16 %v41_v8, %v40_v7  ;;  %v42_v10 = vld [vmem:[%s1924_s2 + $0x30] sm:$0xff]  ;;  %v43_v11 = vld [vmem:[%s1924_s2 + $0x38] sm:$0xff]  ;;  %v21_v12 = vld [vmem:[%s1923_s1 + $0x8] sm:$0xff] }
   0x4   :  { %1065 = vmatpush1.bf16.msra.mxu0 %v1064_v4  ;;  %935 = vmatprep.mubr.msk.f32.mxu0 %vm60_vm0, %v21_v12  ;;  %v1073_v13 = vpack.c.bf16 %v43_v11, %v42_v10  ;;  %v44_v14 = vld [vmem:[%s1924_s2 + $0x40] sm:$0xff]  ;;  %v45_v15 = vld [vmem:[%s1924_s2 + $0x48] sm:$0xff]  ;;  %v192_v19 = vld [vmem:[%s1925_s3 + $0x10] sm:$0xff] }
   0x5   :  { %1066 = vmatprep.subr.bf16.mxu0 %v1221_v3  ;;  %v190_v16 = vld [vmem:[%s1925_s3] sm:$0xff]  ;;  %v191_v17 = vld [vmem:[%s1925_s3 + $0x8] sm:$0xff]  ;;  %v193_v20 = vld [vmem:[%s1925_s3 + $0x18] sm:$0xff]  ;;  %v1076_v21 = vpack.c.bf16 %v45_v15, %v44_v14 }
   0x6   :  { %v1099_v18 = vpack.c.bf16 %v191_v17, %v190_v16  ;;  %v1103_v22 = vpack.c.bf16 %v193_v20, %v192_v19  ;;  %v194_v23 = vld [vmem:[%s1925_s3 + $0x20] sm:$0xff]  ;;  %v195_v24 = vld [vmem:[%s1925_s3 + $0x28] sm:$0xff]  ;;  %v46_v25 = vld [vmem:[%s1924_s2 + $0x50] sm:$0xff] }
   0x7   :  { %v47_v26 = vld [vmem:[%s1924_s2 + $0x58] sm:$0xff]  ;;  %v1107_v27 = vpack.c.bf16 %v195_v24, %v194_v23 }
   0x8   :  { %1068 = vmatpush1.bf16.msra.mxu0 %v1067_v6  ;;  %1100 = vmatprep.subr.bf16.mxu1 %v1099_v18 }
   0x9   :  { %1069 = vmatprep.subr.bf16.mxu0 %v1221_v3  ;;  %1102 = vmatpush3.bf16.msra.mxu1 %v1099_v18 }
   0xa   :  { %1104 = vmatprep.subr.bf16.mxu1 %v1103_v22 }
   0xc   :  { %1071 = vmatpush1.bf16.msra.mxu0 %v1070_v9 }
   0xd   :  { %1072 = vmatprep.subr.bf16.mxu0 %v1221_v3 }
  0x10   :  { %1074 = vmatpush1.bf16.msra.mxu0 %v1073_v13 }
  0x11   :  { %1075 = vmatprep.subr.bf16.mxu0 %v1221_v3 }
  0x12   :  { %11 = vsyncpa [#allocation3], 0  ;;  %v1079_v28 = vpack.c.bf16 %v47_v26, %v46_v25  ;;  %v196_v29 = vld [vmem:[%s1925_s3 + $0x30] sm:$0xff]  ;;  %v197_v30 = vld [vmem:[%s1925_s3 + $0x38] sm:$0xff]  ;;  %1106 = vmatpush3.bf16.msra.mxu1 %v1103_v22  ;;  %vm546_vm1 = vcmask 130048   ;;  %s924_s6 = sshll.u32 %s1927_s5, 4  ;;  %s925_s6 = int_to_ptr.vmem [resolvable:$true] %s924_s6 }
  0x13   :  { %v48_v31 = vld [vmem:[%s1924_s2 + $0x60] sm:$0xff]  ;;  %v49_v32 = vld [vmem:[%s1924_s2 + $0x68] sm:$0xff]  ;;  %1108 = vmatprep.subr.bf16.mxu1 %v1107_v27  ;;  %v1111_v33 = vpack.c.bf16 %v197_v30, %v196_v29  ;;  %v50_v37 = vld [vmem:[%s1924_s2 + $0x70] sm:$0xff]  ;;  %s1207_s11 = scalar_lea.vmem %s925_s6, 16  ;;  %p1212_p1 = scmp.lt.s32.totalorder %s925_s6, %s925_s6 }
  0x14   :  { %1077 = vmatpush1.bf16.msra.mxu0 %v1076_v21  ;;  %v1082_v34 = vpack.c.bf16 %v49_v32, %v48_v31  ;;  %v198_v35 = vld [vmem:[%s1925_s3 + $0x40] sm:$0xff]  ;;  %v199_v36 = vld [vmem:[%s1925_s3 + $0x48] sm:$0xff]  ;;  %v51_v38 = vld [vmem:[%s1924_s2 + $0x78] sm:$0xff]  ;;  %p1208_p0 = scmp.ne.s32.totalorder %s925_s6, %s1207_s11  ;;  %p1213_p2 = scmp.lt.s32.totalorder %s1207_s11, %s1207_s11 }
  0x15   :  { %1078 = vmatprep.subr.bf16.mxu0 %v1221_v3  ;;  %v1115_v39 = vpack.c.bf16 %v199_v36, %v198_v35  ;;  %v1085_v40 = vpack.c.bf16 %v51_v38, %v50_v37  ;;  %v200_v41 = vld [vmem:[%s1925_s3 + $0x50] sm:$0xff]  ;;  %v201_v42 = vld [vmem:[%s1925_s3 + $0x58] sm:$0xff]  ;;  %v52_v43 = vld [vmem:[%s1924_s2 + $0x80] sm:$0xff] }
  0x16   :  { %1110 = vmatpush3.bf16.msra.mxu1 %v1107_v27  ;;  %v53_v44 = vld [vmem:[%s1924_s2 + $0x88] sm:$0xff]  ;;  %v1119_v45 = vpack.c.bf16 %v201_v42, %v200_v41  ;;  %v202_v47 = vld [vmem:[%s1925_s3 + $0x60] sm:$0xff]  ;;  %v54_v49 = vld [vmem:[%s1924_s2 + $0x90] sm:$0xff]  ;;  %p1214_p3 = por %p1213_p2, %p1212_p1 }
  0x17   :  { %1112 = vmatprep.subr.bf16.mxu1 %v1111_v33  ;;  %v1088_v46 = vpack.c.bf16 %v53_v44, %v52_v43  ;;  %v203_v48 = vld [vmem:[%s1925_s3 + $0x68] sm:$0xff]  ;;  %v55_v50 = vld [vmem:[%s1924_s2 + $0x98] sm:$0xff]  ;;  %v204_v53 = vld [vmem:[%s1925_s3 + $0x70] sm:$0xff] }
  0x18   :  { %1080 = vmatpush1.bf16.msra.mxu0 %v1079_v28  ;;  %v1123_v51 = vpack.c.bf16 %v203_v48, %v202_v47  ;;  %v1091_v52 = vpack.c.bf16 %v55_v50, %v54_v49  ;;  %v205_v54 = vld [vmem:[%s1925_s3 + $0x78] sm:$0xff]  ;;  %v56_v55 = vld [vmem:[%s1924_s2 + $0xa0] sm:$0xff]  ;;  %v57_v56 = vld [vmem:[%s1924_s2 + $0xa8] sm:$0xff]  ;;  %p1215_p4 = pnand %p1214_p3, %p1208_p0 }
  0x19   :  { %1081 = vmatprep.subr.bf16.mxu0 %v1221_v3  ;;  %v1127_v57 = vpack.c.bf16 %v205_v54, %v204_v53  ;;  %v1094_v58 = vpack.c.bf16 %v57_v56, %v56_v55  ;;  %v58_v59 = vld [vmem:[%s1924_s2 + $0xb0] sm:$0xff]  ;;  %v59_v60 = vld [vmem:[%s1924_s2 + $0xb8] sm:$0xff]  ;;  %v20_v62 = vld [vmem:[%s1923_s1] sm:$0xff] }
  0x1a   :  { %1114 = vmatpush3.bf16.msra.mxu1 %v1111_v33  ;;  %v1097_v61 = vpack.c.bf16 %v59_v60, %v58_v59  ;;  %v23_v63 = vld [vmem:[%s1923_s1 + $0x18] sm:$0xff]  ;;  %v22_v0 = vld [vmem:[%s1923_s1 + $0x10] sm:$0xff]  ;;  %v25_v1 = vld [vmem:[%s1923_s1 + $0x28] sm:$0xff]  ;;  %v1222_v33 = vmov 0  }
  0x1b   :  { %1116 = vmatprep.subr.bf16.mxu1 %v1115_v39  ;;  %v24_v2 = vld [vmem:[%s1923_s1 + $0x20] sm:$0xff]  ;;  %v26_v4 = vld [vmem:[%s1923_s1 + $0x30] sm:$0xff]  ;;  %v29_v5 = vld [vmem:[%s1923_s1 + $0x48] sm:$0xff]  ;;  %1158 = vset.pattern.permute.xlu1 %v1222_v33 }
  0x1c   :  { %1083 = vmatpush1.bf16.msra.mxu0 %v1082_v34  ;;  %v28_v6 = vld [vmem:[%s1923_s1 + $0x40] sm:$0xff]  ;;  %v31_v7 = vld [vmem:[%s1923_s1 + $0x58] sm:$0xff]  ;;  %v30_v8 = vld [vmem:[%s1923_s1 + $0x50] sm:$0xff]  ;;  %1157 = vset.pattern.permute.xlu0 %v1222_v33 }
  0x1d   :  { %1084 = vmatprep.subr.bf16.mxu0 %v1221_v3  ;;  %v33_v9 = vld [vmem:[%s1923_s1 + $0x68] sm:$0xff]  ;;  %v32_v10 = vld [vmem:[%s1923_s1 + $0x60] sm:$0xff]  ;;  %v35_v11 = vld [vmem:[%s1923_s1 + $0x78] sm:$0xff] }
  0x1e   :  { %1118 = vmatpush3.bf16.msra.mxu1 %v1115_v39  ;;  %v34_v12 = vld [vmem:[%s1923_s1 + $0x70] sm:$0xff]  ;;  %v1486_v54 = vld [vmem:[%s1922_s0 + $0x8] sm:$0xff]  ;;  %v1503_v59 = vld [vmem:[%s1922_s0] sm:$0xff] }
  0x1f   :  { %1120 = vmatprep.subr.bf16.mxu1 %v1119_v45 }
  0x20   :  { %1086 = vmatpush1.bf16.msra.mxu0 %v1085_v40 }
  0x21   :  { %1087 = vmatprep.subr.bf16.mxu0 %v1221_v3 }
  0x22   :  { %1122 = vmatpush3.bf16.msra.mxu1 %v1119_v45 }
  0x23   :  { %1124 = vmatprep.subr.bf16.mxu1 %v1123_v51 }
  0x24   :  { %1089 = vmatpush1.bf16.msra.mxu0 %v1088_v46 }
  0x25   :  { %1090 = vmatprep.subr.bf16.mxu0 %v1221_v3 }
  0x26   :  { %1126 = vmatpush3.bf16.msra.mxu1 %v1123_v51 }
  0x27   :  { %1128 = vmatprep.subr.bf16.mxu1 %v1127_v57 }
  0x28   :  { %1092 = vmatpush1.bf16.msra.mxu0 %v1091_v52 }
  0x29   :  { %1093 = vmatprep.subr.bf16.mxu0 %v1221_v3 }
  0x2a   :  { %1130 = vmatpush3.bf16.msra.mxu1 %v1127_v57  ;;  %v1496_v57 = vld [vmem:[%s1922_s0 + $0x10] sm:$0xff] }
  0x2c   :  { %1095 = vmatpush1.bf16.msra.mxu0 %v1094_v58 }
  0x2d   :  { %1096 = vmatprep.subr.bf16.mxu0 %v1221_v3  ;;  %v27_v3 = vld [vmem:[%s1923_s1 + $0x38] sm:$0xff] }
  0x30   :  { %1098 = vmatpush1.bf16.msra.mxu0 %v1097_v61  ;;  %v1511_v61 = vld [vmem:[%s1922_s0 + $0x18] sm:$0xff] }
  0x33   :  { %150 = vmatmul.mubr.f32.vlgmr.msra.gmra.mrb[0].mxu0 %v20_v62  ;;  %v1518_v62 = vld [vmem:[%s1922_s0 + $0x20] sm:$0xff] }
  0x34   :  { %936 = vmatprep.mubr.msk.f32.mxu0 %vm60_vm0, %v23_v63  ;;  %v1524_v63 = vld [vmem:[%s1922_s0 + $0x28] sm:$0xff] }
  0x37   :  { %155 = vmatmul.mubr.f32.gmra.mrb[2].mxu0 %v22_v0  ;;  %v1530_v0 = vld [vmem:[%s1922_s0 + $0x30] sm:$0xff] }
  0x38   :  { %937 = vmatprep.mubr.msk.f32.mxu0 %vm60_vm0, %v25_v1  ;;  %v1536_v1 = vld [vmem:[%s1922_s0 + $0x38] sm:$0xff] }
  0x3b   :  { %160 = vmatmul.mubr.f32.gmra.mrb[4].mxu0 %v24_v2 }
  0x3c   :  { %938 = vmatprep.mubr.msk.f32.mxu0 %vm60_vm0, %v27_v3 }
  0x3f   :  { %165 = vmatmul.mubr.f32.gmra.mrb[6].mxu0 %v26_v4 }
  0x40   :  { %939 = vmatprep.mubr.msk.f32.mxu0 %vm60_vm0, %v29_v5 }
  0x43   :  { %170 = vmatmul.mubr.f32.gmra.mrb[8].mxu0 %v28_v6 }
  0x44   :  { %940 = vmatprep.mubr.msk.f32.mxu0 %vm60_vm0, %v31_v7 }
  0x47   :  { %175 = vmatmul.mubr.f32.gmra.mrb[10].mxu0 %v30_v8  ;;  %v416_v8 = vlaneseq }
  0x48   :  { %941 = vmatprep.mubr.msk.f32.mxu0 %vm60_vm0, %v33_v9 }
  0x4b   :  { %180 = vmatmul.mubr.f32.gmra.mrb[12].mxu0 %v32_v10  ;;  %v1553_v10 = vand.u32 127, %v416_v8 }
  0x4c   :  { %942 = vmatprep.mubr.msk.f32.mxu0 %vm60_vm0, %v35_v11 }
  0x4f   :  { %185 = vmatmul.mubr.f32.gmra.mrb[14].mxu0 %v34_v12  ;;  %v1555_v12 = vshrl.u32 %v416_v8, 7 }
  0x51   :  { %vm427_vm9 = vcmp.eq.s32.totalorder %v1555_v12, %v1553_v10 }
 0x106   :  { %v151_v13 = vpop.f32.mrb[0].mxu0 }
 0x107   :  { %v153_v14 = vpop.f32.mrb[1].mxu0  ;;  %1023 = vmatprep.mubr.f32.mxu1 %v151_v13 }
 0x10a   :  { %v156_v15 = vpop.f32.mrb[2].mxu0 }
 0x10b   :  { %v1131_v16 = vpack.c.bf16 %v156_v15, %v151_v13  ;;  %v158_v17 = vpop.f32.mrb[3].mxu0  ;;  %1024 = vmatmul.mubr.f32.vlgmr.msra.gmra.mrb[0].mxu1 %v156_v15 }
 0x10d   :  { %1132 = vmatprep.subr.bf16.mxu1 %v1131_v16 }
 0x10e   :  { %v161_v18 = vpop.f32.mrb[4].mxu0  ;;  %1134 = vmatpush3.bf16.xpose.msra.mxu1 %v1131_v16 }
 0x10f   :  { %v163_v19 = vpop.f32.mrb[5].mxu0  ;;  %1026 = vmatprep.mubr.f32.mxu1 %v161_v18 }
 0x112   :  { %v166_v20 = vpop.f32.mrb[6].mxu0 }
 0x113   :  { %v1135_v21 = vpack.c.bf16 %v166_v20, %v161_v18  ;;  %v168_v22 = vpop.f32.mrb[7].mxu0  ;;  %1027 = vmatmul.mubr.f32.gmra.mrb[2].mxu1 %v166_v20 }
 0x115   :  { %1136 = vmatprep.subr.bf16.mxu1 %v1135_v21 }
 0x116   :  { %v171_v23 = vpop.f32.mrb[8].mxu0  ;;  %1138 = vmatpush3.bf16.xpose.msra.mxu1 %v1135_v21 }
 0x117   :  { %v173_v24 = vpop.f32.mrb[9].mxu0  ;;  %1029 = vmatprep.mubr.f32.mxu1 %v171_v23 }
 0x11a   :  { %v176_v25 = vpop.f32.mrb[10].mxu0 }
 0x11b   :  { %v1139_v26 = vpack.c.bf16 %v176_v25, %v171_v23  ;;  %v178_v27 = vpop.f32.mrb[11].mxu0  ;;  %1030 = vmatmul.mubr.f32.gmra.mrb[4].mxu1 %v176_v25 }
 0x11d   :  { %1140 = vmatprep.subr.bf16.mxu1 %v1139_v26 }
 0x11e   :  { %v181_v28 = vpop.f32.mrb[12].mxu0  ;;  %1142 = vmatpush3.bf16.xpose.msra.mxu1 %v1139_v26 }
 0x11f   :  { %v183_v29 = vpop.f32.mrb[13].mxu0  ;;  %1032 = vmatprep.mubr.f32.mxu1 %v181_v28 }
 0x122   :  { %v186_v30 = vpop.f32.mrb[14].mxu0 }
 0x123   :  { %v1143_v31 = vpack.c.bf16 %v186_v30, %v181_v28  ;;  %v188_v32 = vpop.f32.mrb[15].mxu0  ;;  %1033 = vmatmul.mubr.f32.gmra.mrb[6].mxu1 %v186_v30 }
 0x124   :  { %1051 = vmatprep.mubr.f32.mxu1 %v151_v13  ;;  %v1592_v32 = vadd.s32 16, %v1555_v12 }
 0x125   :  { %1144 = vmatprep.subr.bf16.mxu1 %v1143_v31 }
 0x126   :  { %1146 = vmatpush3.bf16.xpose.msra.mxu1 %v1143_v31  ;;  %vm429_vm11 = vcmp.eq.s32.totalorder %v1592_v32, %v1553_v10 }
 0x12d   :  { %1052 = vmatmul.mubr.f32.vlgmr.msra.gmra.mrb[8].mxu1 %v156_v15 }
 0x12e   :  { %1054 = vmatprep.mubr.f32.mxu1 %v161_v18  ;;  %v1563_v18 = vadd.s32 8, %v1555_v12 }
 0x130   :  { %vm428_vm6 = vcmp.eq.s32.totalorder %v1563_v18, %v1553_v10 }
 0x131   :  { %1055 = vmatmul.mubr.f32.gmra.mrb[10].mxu1 %v166_v20 }
 0x132   :  { %1057 = vmatprep.mubr.f32.mxu1 %v171_v23  ;;  %v1574_v23 = vadd.s32 24, %v1555_v12 }
 0x134   :  { %vm430_vm8 = vcmp.eq.s32.totalorder %v1574_v23, %v1553_v10 }
 0x135   :  { %1058 = vmatmul.mubr.f32.gmra.mrb[12].mxu1 %v176_v25 }
 0x136   :  { %1060 = vmatprep.mubr.f32.mxu1 %v181_v28 }
 0x139   :  { %1061 = vmatmul.mubr.f32.gmra.mrb[14].mxu1 %v186_v30 }
 0x1de   :  { %v1443_v34 = vpop.f32.mrb[0].mxu1 }
 0x1df   :  { %v1445_v35 = vpop.f32.mrb[1].mxu1  ;;  %v550_v36 = vsel %vm546_vm1, %v1443_v34, -inf }
 0x1e0   :  { %551 = vmax.xlane.f32.xlu0 %v550_v36  ;;  %v547_v37 = vsel %vm546_vm1, %v1445_v35, -inf }
 0x1e4   :  { %548 = vmax.xlane.f32.xlu0 %v547_v37 }
 0x1e6   :  { %v1451_v38 = vpop.f32.mrb[2].mxu1 }
 0x1e7   :  { %v1453_v39 = vpop.f32.mrb[3].mxu1  ;;  %v556_v40 = vsel %vm546_vm1, %v1451_v38, -inf }
 0x1e8   :  { %557 = vmax.xlane.f32.xlu1 %v556_v40  ;;  %v553_v41 = vsel %vm546_vm1, %v1453_v39, -inf }
 0x1ec   :  { %554 = vmax.xlane.f32.xlu1 %v553_v41  ;;  %v1606_v41 = vcvt.s32.f32 %v1553_v10 }
 0x1ee   :  { %v1459_v42 = vpop.f32.mrb[4].mxu1 }
 0x1ef   :  { %v1461_v43 = vpop.f32.mrb[5].mxu1  ;;  %v562_v44 = vsel %vm546_vm1, %v1459_v42, -inf }
 0x1f0   :  { %563 = vmax.xlane.f32.xlu1 %v562_v44  ;;  %v559_v45 = vsel %vm546_vm1, %v1461_v43, -inf }
 0x1f1   :  { %560 = vmax.xlane.f32.xlu0 %v559_v45 }
 0x1f6   :  { %v1467_v46 = vpop.f32.mrb[6].mxu1 }
 0x1f7   :  { %v1469_v47 = vpop.f32.mrb[7].mxu1  ;;  %v568_v48 = vsel %vm546_vm1, %v1467_v46, -inf }
 0x1f8   :  { %569 = vmax.xlane.f32.xlu1 %v568_v48  ;;  %v565_v49 = vsel %vm546_vm1, %v1469_v47, -inf }
 0x1f9   :  { %566 = vmax.xlane.f32.xlu0 %v565_v49 }
 0x200   :  { %v1475_v50 = vpop.f32.mrb[8].mxu1 }
 0x201   :  { %v1477_v51 = vpop.f32.mrb[9].mxu1  ;;  %v436_v29 = vsel %vm428_vm6, %v1475_v50, 0.0 }
 0x202   :  { %v1597_v36 = vsel %vm60_vm0, %v436_v29, 0.0  ;;  %v435_v44 = vsel %vm427_vm9, %v1477_v51, 0.0 }
 0x204   :  { %v1479_v52 = vpop.f32.mrb[10].mxu1 }
 0x205   :  { %v1481_v53 = vpop.f32.mrb[11].mxu1  ;;  %v438_v40 = vsel %vm430_vm8, %v1479_v52, 0.0 }
 0x206   :  { %v1621_v8 = vsel %vm60_vm0, %v438_v40, 0.0 }
 0x208   :  { %v1488_v55 = vpop.f32.mrb[12].mxu1 }
 0x209   :  { %518 = vperm.xlu1 %1158, %v1486_v54   ;;  %v1491_v56 = vpop.f32.mrb[13].mxu1 }
 0x20c   :  { %v1498_v58 = vpop.f32.mrb[14].mxu1 }
 0x20d   :  { %521 = vperm.xlu1 %1158, %v1496_v57   ;;  %v1506_v60 = vpop.f32.mrb[15].mxu1 }
 0x20f   :  { %515 = vperm.xlu0 %1157, %v1503_v59  }
 0x211   :  { %524 = vperm.xlu1 %1158, %v1511_v61  }
 0x215   :  { %527 = vperm.xlu1 %1158, %v1518_v62  }
 0x219   :  { %530 = vperm.xlu1 %1158, %v1524_v63  }
 0x21d   :  { %533 = vperm.xlu1 %1158, %v1530_v0  }
 0x221   :  { %536 = vperm.xlu1 %1158, %v1536_v1  }
 0x26d   :  { %v1543_v4 = vpop.xlane.xlu0 %551 }
 0x26e   :  { %v572_v33 = vsub.f32 %v1443_v34, %v1543_v4  ;;  %vm710_vm10 = vcmp.ge.f32.partialorder %v1443_v34, %v1543_v4 }
 0x270   :  { %v581_v48 = vmul.f32 1.442695, %v572_v33 }
 0x271   :  { %v1547_v6 = vpop.xlane.xlu0 %548 }
 0x272   :  { %v571_v24 = vsub.f32 %v1445_v35, %v1547_v6  ;;  %vm709_vm13 = vcmp.ge.f32.partialorder %v1445_v35, %v1547_v6 }
 0x274   :  { %v579_v30 = vmul.f32 1.442695, %v571_v24 }
 0x275   :  { %v1539_v2 = vpop.xlane.xlu1 %557 }
 0x276   :  { %1159 = vpow2.f32 %v579_v30  ;;  %v574_v45 = vsub.f32 %v1451_v38, %v1539_v2  ;;  %vm712_vm14 = vcmp.ge.f32.partialorder %v1451_v38, %v1539_v2 }
 0x277   :  { %1161 = vpow2.f32 %v581_v48  ;;  %v720_v30 = vsel %vm712_vm14, %v1606_v41, 16.0 }
 0x279   :  { %v1541_v3 = vpop.xlane.xlu1 %554 }
 0x27a   :  { %v573_v49 = vsub.f32 %v1453_v39, %v1541_v3  ;;  %vm711_vm12 = vcmp.ge.f32.partialorder %v1453_v39, %v1541_v3 }
 0x27d   :  { %v1545_v5 = vpop.xlane.xlu1 %563 }
 0x27e   :  { %v1551_v9 = vpop.xlane.xlu0 %560 }
 0x27f   :  { %vm713_vm15 = vcmp.ge.f32.partialorder %v1461_v43, %v1551_v9 }
 0x280   :  { %v721_v40 = vsel %vm713_vm15, %v1606_v41, 16.0 }
 0x285   :  { %v1549_v7 = vpop.xlane.xlu1 %569 }
 0x286   :  { %v1557_v13 = vpop.xlane.xlu0 %566  ;;  %vm716_vm15 = vcmp.ge.f32.partialorder %v1467_v46, %v1549_v7 }
 0x289   :  { %v519_v11 = vpop.permute.xlu1 %518 }
 0x28a   :  { %vm539_vm2 = vcmp.eq.s32.totalorder %v1553_v10, %v519_v11  ;;  %v1625_v11 = vsel %vm60_vm0, %v435_v44, 0.0 }
 0x28b   :  { %v644_v14 = vsel %vm539_vm2, %v1443_v34, 0.0  ;;  %v718_v34 = vsel %vm710_vm10, %v1606_v41, 16.0 }
 0x28c   :  { %v654_v15 = vsel %vm546_vm1, %v644_v14, 0.0  ;;  %v437_v14 = vsel %vm429_vm11, %v1481_v53, 0.0 }
 0x28d   :  { %655 = vadd.xlane.f32.xlu1 %v654_v15  ;;  %v522_v16 = vpop.permute.xlu1 %521  ;;  %v585_v15 = vmul.f32 1.442695, %v574_v45  ;;  %v737_v45 = vsel %vm546_vm1, %v721_v40, inf }
 0x28e   :  { %v516_v17 = vpop.permute.xlu0 %515  ;;  %vm540_vm3 = vcmp.eq.s32.totalorder %v1553_v10, %v522_v16  ;;  %v576_v16 = vsub.f32 %v1459_v42, %v1545_v5 }
 0x28f   :  { %vm538_vm4 = vcmp.eq.s32.totalorder %v1553_v10, %v516_v17  ;;  %v645_v22 = vsel %vm540_vm3, %v1453_v39, 0.0  ;;  %v583_v17 = vmul.f32 1.442695, %v573_v49  ;;  %v719_v39 = vsel %vm711_vm12, %v1606_v41, 16.0 }
 0x290   :  { %v643_v19 = vsel %vm538_vm4, %v1445_v35, 0.0  ;;  %v657_v28 = vsel %vm546_vm1, %v645_v22, 0.0  ;;  %v717_v22 = vsel %vm709_vm13, %v1606_v41, 16.0  ;;  %1163 = vpow2.f32 %v585_v15 }
 0x291   :  { %v525_v20 = vpop.permute.xlu1 %524  ;;  %v651_v21 = vsel %vm546_vm1, %v643_v19, 0.0  ;;  %v575_v19 = vsub.f32 %v1461_v43, %v1551_v9  ;;  %v589_v24 = vmul.f32 1.442695, %v576_v16  ;;  %v578_v35 = vsub.f32 %v1467_v46, %v1549_v7 }
 0x292   :  { %vm541_vm5 = vcmp.eq.s32.totalorder %v1553_v10, %v525_v20  ;;  %652 = vadd.xlane.f32.xlu0 %v651_v21  ;;  %v728_v20 = vsel %vm546_vm1, %v718_v34, inf  ;;  %v1643_v21 = vsel %vm60_vm0, %v437_v14, 0.0  ;;  %1165 = vpow2.f32 %v583_v17 }
 0x293   :  { %v646_v25 = vsel %vm541_vm5, %v1451_v38, 0.0  ;;  %v725_v29 = vsel %vm546_vm1, %v717_v22, inf  ;;  %1167 = vpow2.f32 %v589_v24  ;;  %vm714_vm5 = vcmp.ge.f32.partialorder %v1459_v42, %v1545_v5 }
 0x294   :  { %v660_v26 = vsel %vm546_vm1, %v646_v25, 0.0  ;;  %v587_v25 = vmul.f32 1.442695, %v575_v19  ;;  %v1667_v19 = vadd.s32 32, %v1555_v12 }
 0x295   :  { %661 = vadd.xlane.f32.xlu1 %v660_v26  ;;  %v528_v27 = vpop.permute.xlu1 %527  ;;  %v577_v26 = vsub.f32 %v1469_v47, %v1557_v13 }
 0x296   :  { %vm542_vm7 = vcmp.eq.s32.totalorder %v1553_v10, %v528_v27  ;;  %658 = vadd.xlane.f32.xlu0 %v657_v28  ;;  %v731_v27 = vsel %vm546_vm1, %v719_v39, inf  ;;  %v1160_v28 = vpop.eup %1159  ;;  %1169 = vpow2.f32 %v587_v25  ;;  %vm431_vm3 = vcmp.eq.s32.totalorder %v1667_v19, %v1553_v10 }
 0x297   :  { %v647_v31 = vsel %vm542_vm7, %v1461_v43, 0.0  ;;  %v591_v38 = vmul.f32 1.442695, %v577_v26  ;;  %v595_v33 = vsel %vm546_vm1, %v1160_v28, 0.0  ;;  %v1162_v44 = vpop.eup %1161  ;;  %vm715_vm7 = vcmp.ge.f32.partialorder %v1469_v47, %v1557_v13 }
 0x298   :  { %v663_v37 = vsel %vm546_vm1, %v647_v31, 0.0  ;;  %v593_v31 = vmul.f32 1.442695, %v578_v35  ;;  %v598_v43 = vsel %vm546_vm1, %v1162_v44, 0.0  ;;  %v1673_v35 = vadd.s32 40, %v1555_v12 }
 0x299   :  { %447 = vadd.xlane.f32.xlu1 %v1597_v36  ;;  %v531_v17 = vpop.permute.xlu1 %530 }
 0x29a   :  { %664 = vadd.xlane.f32.xlu0 %v663_v37  ;;  %v734_v37 = vsel %vm546_vm1, %v720_v30, inf  ;;  %1171 = vpow2.f32 %v593_v31  ;;  %v1164_v48 = vpop.eup %1163  ;;  %vm543_vm2 = vcmp.eq.s32.totalorder %v1553_v10, %v531_v17  ;;  %vm432_vm4 = vcmp.eq.s32.totalorder %v1673_v35, %v1553_v10 }
 0x29b   :  { %1173 = vpow2.f32 %v591_v38  ;;  %v604_v34 = vsel %vm546_vm1, %v1164_v48, 0.0  ;;  %v648_v28 = vsel %vm543_vm2, %v1459_v42, 0.0  ;;  %v440_v38 = vsel %vm432_vm4, %v1488_v55, 0.0 }
 0x29c   :  { %v1166_v49 = vpop.eup %1165  ;;  %v666_v30 = vsel %vm546_vm1, %v648_v28, 0.0  ;;  %v458_v40 = vsel %vm60_vm0, %v440_v38, 0.0 }
 0x29d   :  { %453 = vadd.xlane.f32.xlu1 %v1621_v8  ;;  %v1168_v14 = vpop.eup %1167  ;;  %v601_v15 = vsel %vm546_vm1, %v1166_v49, 0.0  ;;  %v534_v26 = vpop.permute.xlu1 %533 }
 0x29e   :  { %444 = vadd.xlane.f32.xlu0 %v1625_v11  ;;  %vm544_vm10 = vcmp.eq.s32.totalorder %v1553_v10, %v534_v26 }
 0x29f   :  { %v649_v48 = vsel %vm544_vm10, %v1469_v47, 0.0 }
 0x2a0   :  { %v1170_v16 = vpop.eup %1169 }
 0x2a1   :  { %729 = vmin.xlane.f32.xlu1 %v728_v20  ;;  %v610_v20 = vsel %vm546_vm1, %v1168_v14, 0.0  ;;  %v607_v22 = vsel %vm546_vm1, %v1170_v16, 0.0  ;;  %v537_v42 = vpop.permute.xlu1 %536 }
 0x2a2   :  { %450 = vadd.xlane.f32.xlu0 %v1643_v21  ;;  %vm545_vm12 = vcmp.eq.s32.totalorder %v1553_v10, %v537_v42 }
 0x2a3   :  { %v650_v14 = vsel %vm545_vm12, %v1467_v46, 0.0  ;;  %v467_v46 = vadd.f32 %v1597_v36, %v1625_v11 }
 0x2a4   :  { %v1172_v39 = vpop.eup %1171  ;;  %v672_v47 = vsel %vm546_vm1, %v650_v14, 0.0  ;;  %v817_v14 = vmul.f32 2.0, %v1479_v52 }
 0x2a5   :  { %732 = vmin.xlane.f32.xlu1 %v731_v27  ;;  %v1174_v24 = vpop.eup %1173  ;;  %v616_v25 = vsel %vm546_vm1, %v1172_v39, 0.0 }
 0x2a6   :  { %726 = vmin.xlane.f32.xlu0 %v725_v29  ;;  %v613_v27 = vsel %vm546_vm1, %v1174_v24, 0.0  ;;  %v439_v29 = vsel %vm431_vm3, %v1491_v56, 0.0  ;;  %v468_v24 = vadd.f32 %v467_v46, %v1643_v21  ;;  %v815_v21 = vmul.f32 2.0, %v1475_v50 }
 0x2a7   :  { %v455_v31 = vsel %vm60_vm0, %v439_v29, 0.0  ;;  %v814_v50 = vmul.f32 2.0, %v1477_v51 }
 0x2a9   :  { %596 = vadd.xlane.f32.xlu1 %v595_v33  ;;  %v722_v33 = vsel %vm714_vm5, %v1606_v41, 16.0 }
 0x2aa   :  { %735 = vmin.xlane.f32.xlu0 %v734_v37  ;;  %v1698_v37 = vadd.s32 48, %v1555_v12  ;;  %v740_v44 = vsel %vm546_vm1, %v722_v33, inf }
 0x2ac   :  { %vm433_vm13 = vcmp.eq.s32.totalorder %v1698_v37, %v1553_v10 }
 0x2ad   :  { %738 = vmin.xlane.f32.xlu1 %v737_v45  ;;  %v723_v45 = vsel %vm715_vm7, %v1606_v41, 16.0 }
 0x2ae   :  { %599 = vadd.xlane.f32.xlu0 %v598_v43  ;;  %v1707_v43 = vadd.s32 56, %v1555_v12  ;;  %v743_v49 = vsel %vm546_vm1, %v723_v45, inf  ;;  %v749_v12 = vcvt.s32.f32 %v1503_v59 }
 0x2b0   :  { %vm434_vm14 = vcmp.eq.s32.totalorder %v1707_v43, %v1553_v10 }
 0x2b1   :  { %605 = vadd.xlane.f32.xlu1 %v604_v34  ;;  %v669_v34 = vsel %vm546_vm1, %v649_v48, 0.0  ;;  %v442_v17 = vsel %vm434_vm14, %v1498_v58, 0.0 }
 0x2b2   :  { %602 = vadd.xlane.f32.xlu0 %v601_v15  ;;  %v441_v15 = vsel %vm433_vm13, %v1506_v60, 0.0  ;;  %v464_v39 = vsel %vm60_vm0, %v442_v17, 0.0 }
 0x2b3   :  { %v461_v16 = vsel %vm60_vm0, %v441_v15, 0.0 }
 0x2b5   :  { %611 = vadd.xlane.f32.xlu1 %v610_v20  ;;  %v724_v20 = vsel %vm716_vm15, %v1606_v41, 16.0 }
 0x2b6   :  { %608 = vadd.xlane.f32.xlu0 %v607_v22  ;;  %v746_v22 = vsel %vm546_vm1, %v724_v20, inf }
 0x2b9   :  { %617 = vadd.xlane.f32.xlu1 %v616_v25  ;;  %v469_v25 = vadd.f32 %v468_v24, %v1621_v8 }
 0x2ba   :  { %614 = vadd.xlane.f32.xlu0 %v613_v27 }
 0x2bb   :  { %v470_v26 = vadd.f32 %v469_v25, %v455_v31 }
 0x2bd   :  { %667 = vadd.xlane.f32.xlu1 %v666_v30  ;;  %v471_v27 = vadd.f32 %v470_v26, %v458_v40  ;;  %v816_v26 = vmul.f32 2.0, %v1481_v53 }
 0x2be   :  { %456 = vadd.xlane.f32.xlu0 %v455_v31 }
 0x2bf   :  { %v472_v28 = vadd.f32 %v471_v27, %v461_v16 }
 0x2c1   :  { %459 = vadd.xlane.f32.xlu1 %v458_v40  ;;  %v473_v29 = vadd.f32 %v472_v28, %v464_v39 }
 0x2c2   :  { %741 = vmin.xlane.f32.xlu0 %v740_v44 }
 0x2c3   :  { %v474_v30 = vrot.slane %v473_v29, 4 }
 0x2c5   :  { %744 = vmin.xlane.f32.xlu1 %v743_v49  ;;  %v475_v38 = vadd.f32 %v474_v30, %v473_v29 }
 0x2c6   :  { %670 = vadd.xlane.f32.xlu0 %v669_v34 }
 0x2c7   :  { %v476_v41 = vrot.slane %v475_v38, 2 }
 0x2c9   :  { %673 = vadd.xlane.f32.xlu1 %v672_v47  ;;  %v477_v33 = vadd.f32 %v476_v41, %v475_v38 }
 0x2ca   :  { %462 = vadd.xlane.f32.xlu0 %v461_v16 }
 0x2cb   :  { %v478_v45 = vrot.slane %v477_v33, 1 }
 0x2cd   :  { %465 = vadd.xlane.f32.xlu1 %v464_v39  ;;  %v1743_v11 = vadd.f32 %v478_v45, %v477_v33  ;;  %v750_v33 = vcvt.s32.f32 %v1486_v54 }
 0x2ce   :  { %747 = vmin.xlane.f32.xlu0 %v746_v22 }
 0x31a   :  { %v1735_v42 = vpop.xlane.xlu1 %655 }
 0x31f   :  { %v1737_v44 = vpop.xlane.xlu0 %652 }
 0x322   :  { %v1739_v48 = vpop.xlane.xlu1 %661 }
 0x323   :  { %v1741_v36 = vpop.xlane.xlu0 %658 }
 0x326   :  { %v1745_v8 = vpop.xlane.xlu1 %447 }
 0x327   :  { %v807_v31 = vadd.f32 %v1743_v11, %v1745_v8  ;;  %v1750_v40 = vpop.xlane.xlu0 %664 }
 0x329   :  { %v823_v49 = vsub.f32 %v807_v31, %v815_v21 }
 0x32a   :  { %v1752_v34 = vpop.xlane.xlu1 %453 }
 0x32b   :  { %v831_v15 = vmax.f32 %v823_v49, 0.0  ;;  %v809_v47 = vadd.f32 %v1743_v11, %v1752_v34  ;;  %v1757_v16 = vpop.xlane.xlu0 %444 }
 0x32c   :  { %v806_v17 = vadd.f32 %v1743_v11, %v1757_v16 }
 0x32d   :  { %v839_v20 = vsel %vm428_vm6, 0.0, %v831_v15  ;;  %v825_v39 = vsub.f32 %v809_v47, %v817_v14 }
 0x32e   :  { %1175 = vrsqrt.f32 %v839_v20  ;;  %v730_v22 = vpop.xlane.xlu1 %729  ;;  %v822_v52 = vsub.f32 %v806_v17, %v814_v50  ;;  %vm855_vm1 = vcmp.eq.f32.partialorder %v839_v20, inf  ;;  %v858_v31 = vand.u32 2147483648, %v839_v20 }
 0x32f   :  { %v833_v46 = vmax.f32 %v825_v39, 0.0  ;;  %v1765_v24 = vpop.xlane.xlu0 %450  ;;  %vm857_vm6 = vcmp.eq.f32.partialorder %v839_v20, 0.0  ;;  %v751_v50 = vcvt.s32.f32 %v1496_v57 }
 0x330   :  { %v808_v25 = vadd.f32 %v1743_v11, %v1765_v24  ;;  %v830_v27 = vmax.f32 %v822_v52, 0.0 }
 0x331   :  { %v841_v51 = vsel %vm430_vm8, 0.0, %v833_v46  ;;  %vm1786_vm8 = vcmp.eq.f32.partialorder %v730_v22, %v750_v33  ;;  %v1223_v46 = vmov 0.0   ;;  %v753_v33 = vcvt.s32.f32 %v1518_v62 }
 0x332   :  { %1177 = vrsqrt.f32 %v841_v51  ;;  %v733_v18 = vpop.xlane.xlu1 %732  ;;  %v838_v28 = vsel %vm427_vm9, 0.0, %v830_v27  ;;  %v824_v29 = vsub.f32 %v808_v25, %v816_v26  ;;  %vm869_vm2 = vcmp.eq.f32.partialorder %v841_v51, inf }
 0x333   :  { %v727_v30 = vpop.xlane.xlu0 %726  ;;  %1179 = vrsqrt.f32 %v838_v28  ;;  %vm871_vm5 = vcmp.eq.f32.partialorder %v841_v51, 0.0  ;;  %v872_v22 = vand.u32 2147483648, %v841_v51  ;;  %v944_v52 = vsel %vm1786_vm8, 1.0, %v1223_v46 }
 0x334   :  { %v832_v38 = vmax.f32 %v824_v29, 0.0  ;;  %vm1790_vm9 = vcmp.eq.f32.partialorder %v727_v30, %v749_v12  ;;  %vm848_vm7 = vcmp.eq.f32.partialorder %v838_v28, inf  ;;  %vm850_vm10 = vcmp.eq.f32.partialorder %v838_v28, 0.0 }
 0x335   :  { %v943_v29 = vsel %vm1790_vm9, 1.0, %v1223_v46  ;;  %vm759_vm12 = vcmp.eq.f32.partialorder %v733_v18, %v751_v50 }
 0x336   :  { %v597_v41 = vpop.xlane.xlu1 %596  ;;  %v1780_v53 = vsel %vm429_vm11, 0.0, %v832_v38  ;;  %vm480_vm11 = vcmask 7168  }
 0x337   :  { %1181 = vlog2.f32 %v597_v41  ;;  %v736_v23 = vpop.xlane.xlu0 %735  ;;  %v482_v41 = vsel %vm480_vm11, %v1745_v8, 0.0  ;;  %v481_v12 = vsel %vm480_vm11, %v1757_v16, 0.0  ;;  %v782_v8 = vsel %vm480_vm11, %v944_v52, 0.0 }
 0x338   :  { %v1176_v45 = vpop.eup %1175  ;;  %1183 = vrsqrt.f32 %v1780_v53  ;;  %vm862_vm15 = vcmp.eq.f32.partialorder %v1780_v53, inf  ;;  %v865_v16 = vand.u32 2147483648, %v1780_v53  ;;  %v483_v17 = vadd.f32 %v482_v41, %v481_v12 }
 0x339   :  { %v854_v21 = vmul.f32 %v1176_v45, %v839_v20  ;;  %v754_v41 = vcvt.s32.f32 %v1524_v63 }
 0x33a   :  { %v1784_v49 = vpop.xlane.xlu1 %738 }
 0x33b   :  { %v856_v14 = vsel %vm855_vm1, %v839_v20, %v854_v21  ;;  %v600_v32 = vpop.xlane.xlu0 %599  ;;  %v752_v20 = vcvt.s32.f32 %v1511_v61  ;;  %v851_v61 = vand.u32 2147483648, %v838_v28  ;;  %vm761_vm8 = vcmp.eq.f32.partialorder %v1784_v49, %v753_v33 }
 0x33c   :  { %v1178_v15 = vpop.eup %1177  ;;  %v859_v47 = vsel %vm857_vm6, %v858_v31, %v856_v14  ;;  %1185 = vlog2.f32 %v600_v32  ;;  %v781_v31 = vsel %vm480_vm11, %v943_v29, 0.0  ;;  %vm864_vm6 = vcmp.eq.f32.partialorder %v1780_v53, 0.0 }
 0x33d   :  { %903 = vst.msk [vmem:[%s1926_s4 + $0x8] sm:$0xff] %vm60_vm0, %v859_v47  ;;  %v868_v59 = vmul.f32 %v1178_v15, %v841_v51  ;;  %v1180_v39 = vpop.eup %1179  ;;  %vm760_vm1 = vcmp.eq.f32.partialorder %v736_v23, %v752_v20  ;;  %v945_v32 = vsel %vm759_vm12, 1.0, %v1223_v46  ;;  %v783_v15 = vadd.f32 %v782_v8, %v781_v31 }
 0x33e   :  { %v606_v25 = vpop.xlane.xlu1 %605  ;;  %v847_v27 = vmul.f32 %v1180_v39, %v838_v28  ;;  %v946_v20 = vsel %vm760_vm1, 1.0, %v1223_v46  ;;  %v784_v52 = vsel %vm480_vm11, %v945_v32, 0.0  ;;  %v947_v49 = vsel %vm761_vm8, 1.0, %v1223_v46 }
 0x33f   :  { %v870_v26 = vsel %vm869_vm2, %v841_v51, %v868_v59  ;;  %1187 = vlog2.f32 %v606_v25  ;;  %v603_v57 = vpop.xlane.xlu0 %602  ;;  %v484_v59 = vsel %vm480_vm11, %v1765_v24, 0.0  ;;  %v819_v25 = vmul.f32 2.0, %v1488_v55 }
 0x340   :  { %v873_v30 = vsel %vm871_vm5, %v872_v22, %v870_v26  ;;  %1189 = vlog2.f32 %v603_v57  ;;  %v849_v51 = vsel %vm848_vm7, %v838_v28, %v847_v27  ;;  %v485_v26 = vadd.f32 %v484_v59, %v483_v17 }
 0x341   :  { %v1182_v38 = vpop.eup %1181  ;;  %905 = vst.msk [vmem:[%s1926_s4 + $0x18] sm:$0xff] %vm60_vm0, %v873_v30  ;;  %v852_v21 = vsel %vm850_vm10, %v851_v61, %v849_v51  ;;  %v785_v27 = vadd.f32 %v784_v52, %v783_v15  ;;  %v786_v30 = vsel %vm480_vm11, %v946_v20, 0.0 }
 0x342   :  { %v1184_v45 = vpop.eup %1183  ;;  %v612_v14 = vpop.xlane.xlu1 %611  ;;  %902 = vst.msk [vmem:[%s1926_s4] sm:$0xff] %vm60_vm0, %v852_v21  ;;  %v620_v54 = vmul.f32 0.6931472, %v1182_v38  ;;  %v755_v21 = vcvt.s32.f32 %v1530_v0 }
 0x343   :  { %v861_v28 = vmul.f32 %v1184_v45, %v1780_v53  ;;  %1191 = vlog2.f32 %v612_v14  ;;  %v609_v62 = vpop.xlane.xlu0 %608  ;;  %v787_v14 = vadd.f32 %v786_v30, %v785_v27 }
 0x344   :  { %1193 = vlog2.f32 %v609_v62  ;;  %v635_v23 = vadd.f32 %v620_v54, %v1547_v6  ;;  %v818_v6 = vmul.f32 2.0, %v1491_v56 }
 0x345   :  { %v863_v18 = vsel %vm862_vm15, %v1780_v53, %v861_v28 }
 0x346   :  { %v1186_v47 = vpop.eup %1185  ;;  %v866_v50 = vsel %vm864_vm6, %v865_v16, %v863_v18  ;;  %v618_v39 = vpop.xlane.xlu1 %617  ;;  %v675_v51 = vsub.f32 %v635_v23, %v1737_v44 }
 0x347   :  { %904 = vst.msk [vmem:[%s1926_s4 + $0x10] sm:$0xff] %vm60_vm0, %v866_v50  ;;  %v622_v53 = vmul.f32 0.6931472, %v1186_v47  ;;  %1195 = vlog2.f32 %v618_v39  ;;  %v615_v22 = vpop.xlane.xlu0 %614 }
 0x348   :  { %1197 = vlog2.f32 %v615_v22 }
 0x349   :  { %v1188_v24 = vpop.eup %1187  ;;  %v636_v29 = vadd.f32 %v622_v53, %v1543_v4  ;;  %v486_v4 = vsel %vm480_vm11, %v1752_v34, 0.0 }
 0x34a   :  { %v1190_v57 = vpop.eup %1189  ;;  %v626_v61 = vmul.f32 0.6931472, %v1188_v24  ;;  %v668_v38 = vpop.xlane.xlu1 %667  ;;  %v487_v8 = vadd.f32 %v486_v4, %v485_v26 }
 0x34b   :  { %v676_v33 = vsub.f32 %v636_v29, %v1735_v42  ;;  %v624_v55 = vmul.f32 0.6931472, %v1190_v57  ;;  %v457_v45 = vpop.xlane.xlu0 %456  ;;  %v788_v42 = vsel %vm480_vm11, %v947_v49, 0.0 }
 0x34c   :  { %v638_v12 = vadd.f32 %v626_v61, %v1539_v2  ;;  %v810_v56 = vadd.f32 %v1743_v11, %v457_v45  ;;  %v683_v2 = vsel %vm480_vm11, %v675_v51, 0.0  ;;  %v488_v17 = vsel %vm480_vm11, %v457_v45, 0.0 }
 0x34d   :  { %v1192_v31 = vpop.eup %1191  ;;  %v684_v63 = vsel %vm480_vm11, %v676_v33, 0.0  ;;  %v637_v44 = vadd.f32 %v624_v55, %v1541_v3  ;;  %v489_v57 = vadd.f32 %v488_v17, %v487_v8  ;;  %v789_v61 = vadd.f32 %v788_v42, %v787_v14 }
 0x34e   :  { %v1194_v28 = vpop.eup %1193  ;;  %v678_v54 = vsub.f32 %v638_v12, %v1739_v48  ;;  %v630_v62 = vmul.f32 0.6931472, %v1192_v31  ;;  %v826_v34 = vsub.f32 %v810_v56, %v818_v6  ;;  %v460_v16 = vpop.xlane.xlu1 %459  ;;  %v685_v47 = vadd.f32 %v684_v63, %v683_v2 }
 0x34f   :  { %v677_v18 = vsub.f32 %v637_v44, %v1741_v36  ;;  %v628_v0 = vmul.f32 0.6931472, %v1194_v28  ;;  %v811_v32 = vadd.f32 %v1743_v11, %v460_v16  ;;  %v742_v15 = vpop.xlane.xlu0 %741  ;;  %v820_v44 = vmul.f32 2.0, %v1506_v60 }
 0x350   :  { %v640_v3 = vadd.f32 %v630_v62, %v1545_v5  ;;  %v834_v59 = vmax.f32 %v826_v34, 0.0  ;;  %v688_v23 = vsel %vm480_vm11, %v678_v54, 0.0  ;;  %vm762_vm9 = vcmp.eq.f32.partialorder %v742_v15, %v754_v41 }
 0x351   :  { %v1196_v50 = vpop.eup %1195  ;;  %v686_v48 = vsel %vm480_vm11, %v677_v18, 0.0  ;;  %v639_v39 = vadd.f32 %v628_v0, %v1551_v9  ;;  %v827_v20 = vsub.f32 %v811_v32, %v819_v25  ;;  %v490_v25 = vsel %vm480_vm11, %v460_v16, 0.0 }
 0x352   :  { %v1198_v53 = vpop.eup %1197  ;;  %v634_v36 = vmul.f32 0.6931472, %v1196_v50  ;;  %v687_v22 = vadd.f32 %v686_v48, %v685_v47  ;;  %v1865_v52 = vsel %vm431_vm3, 0.0, %v834_v59  ;;  %v745_v5 = vpop.xlane.xlu1 %744  ;;  %v680_v27 = vsub.f32 %v640_v3, %v668_v38 }
 0x353   :  { %v679_v24 = vsub.f32 %v639_v39, %v1750_v40  ;;  %v632_v26 = vmul.f32 0.6931472, %v1198_v53  ;;  %1199 = vrsqrt.f32 %v1865_v52  ;;  %v671_v9 = vpop.xlane.xlu0 %670  ;;  %v835_v30 = vmax.f32 %v827_v20, 0.0 }
 0x354   :  { %v689_v29 = vadd.f32 %v688_v23, %v687_v22  ;;  %v948_v19 = vsel %vm762_vm9, 1.0, %v1223_v46  ;;  %vm763_vm3 = vcmp.eq.f32.partialorder %v745_v5, %v755_v21  ;;  %v692_v49 = vsel %vm480_vm11, %v680_v27, 0.0 }
 0x355   :  { %v690_v6 = vsel %vm480_vm11, %v679_v24, 0.0  ;;  %v790_v51 = vsel %vm480_vm11, %v948_v19, 0.0  ;;  %v641_v40 = vadd.f32 %v632_v26, %v1557_v13  ;;  %v843_v33 = vsel %vm432_vm4, 0.0, %v835_v30 }
 0x356   :  { %v691_v41 = vadd.f32 %v690_v6, %v689_v29  ;;  %v674_v38 = vpop.xlane.xlu1 %673  ;;  %v949_v55 = vsel %vm763_vm3, 1.0, %v1223_v46  ;;  %v642_v45 = vadd.f32 %v634_v36, %v1549_v7  ;;  %v491_v56 = vadd.f32 %v490_v25, %v489_v57 }
 0x357   :  { %v463_v4 = vpop.xlane.xlu0 %462  ;;  %1201 = vrsqrt.f32 %v843_v33  ;;  %v756_v21 = vcvt.s32.f32 %v1536_v1  ;;  %v791_v31 = vadd.f32 %v790_v51, %v789_v61  ;;  %v681_v14 = vsub.f32 %v641_v40, %v671_v9 }
 0x358   :  { %v693_v12 = vadd.f32 %v692_v49, %v691_v41  ;;  %v682_v13 = vsub.f32 %v642_v45, %v674_v38  ;;  %v492_v63 = vsel %vm480_vm11, %v463_v4, 0.0  ;;  %v792_v35 = vsel %vm480_vm11, %v949_v55, 0.0 }
 0x359   :  { %v493_v8 = vadd.f32 %v492_v63, %v491_v56  ;;  %v812_v28 = vadd.f32 %v1743_v11, %v463_v4  ;;  %v821_v7 = vmul.f32 2.0, %v1498_v58  ;;  %v694_v54 = vsel %vm480_vm11, %v681_v14, 0.0 }
 0x35a   :  { %v466_v42 = vpop.xlane.xlu1 %465  ;;  %v695_v2 = vadd.f32 %v694_v54, %v693_v12  ;;  %v696_v15 = vsel %vm480_vm11, %v682_v13, 0.0  ;;  %v793_v47 = vadd.f32 %v792_v35, %v791_v31  ;;  %vm876_vm2 = vcmp.eq.f32.partialorder %v1865_v52, inf }
 0x35b   :  { %v494_v62 = vsel %vm480_vm11, %v466_v42, 0.0  ;;  %v813_v1 = vadd.f32 %v1743_v11, %v466_v42  ;;  %v748_v34 = vpop.xlane.xlu0 %747  ;;  %v828_v16 = vsub.f32 %v812_v28, %v820_v44  ;;  %v879_v11 = vand.u32 2147483648, %v1865_v52 }
 0x35c   :  { %vm764_vm4 = vcmp.eq.f32.partialorder %v748_v34, %v756_v21  ;;  %v495_v18 = vadd.f32 %v494_v62, %v493_v8  ;;  %v697_v17 = vadd.f32 %v696_v15, %v695_v2  ;;  %vm878_vm5 = vcmp.eq.f32.partialorder %v1865_v52, 0.0 }
 0x35d   :  { %v1200_v60 = vpop.eup %1199  ;;  %v829_v0 = vsub.f32 %v813_v1, %v821_v7  ;;  %v950_v32 = vsel %vm764_vm4, 1.0, %v1223_v46  ;;  %v836_v3 = vmax.f32 %v828_v16, 0.0  ;;  %v886_v22 = vand.u32 2147483648, %v843_v33 }
 0x35e   :  { %v875_v58 = vmul.f32 %v1200_v60, %v1865_v52  ;;  %496 = vadd.xlane.f32.xlu0 %v495_v18  ;;  %v794_v59 = vsel %vm480_vm11, %v950_v32, 0.0  ;;  %698 = vadd.xlane.f32.xlu1 %v697_v17  ;;  %vm883_vm11 = vcmp.eq.f32.partialorder %v843_v33, inf }
 0x35f   :  { %v837_v50 = vmax.f32 %v829_v0, 0.0  ;;  %v795_v48 = vadd.f32 %v794_v59, %v793_v47  ;;  %v844_v46 = vsel %vm433_vm13, 0.0, %v836_v3  ;;  %vm885_vm13 = vcmp.eq.f32.partialorder %v843_v33, 0.0 }
 0x360   :  { %v877_v39 = vsel %vm876_vm2, %v1865_v52, %v875_v58  ;;  %1203 = vrsqrt.f32 %v844_v46  ;;  %vm890_vm7 = vcmp.eq.f32.partialorder %v844_v46, inf  ;;  %v893_v27 = vand.u32 2147483648, %v844_v46 }
 0x361   :  { %v880_v23 = vsel %vm878_vm5, %v879_v11, %v877_v39  ;;  %v1202_v20 = vpop.eup %1201  ;;  %v845_v53 = vsel %vm434_vm14, 0.0, %v837_v50  ;;  %vm892_vm14 = vcmp.eq.f32.partialorder %v844_v46, 0.0 }
 0x362   :  { %906 = vst.msk [vmem:[%s1926_s4 + $0x20] sm:$0xff] %vm60_vm0, %v880_v23  ;;  %796 = vadd.xlane.f32.xlu0 %v795_v48  ;;  %v882_v36 = vmul.f32 %v1202_v20, %v843_v33  ;;  %1205 = vrsqrt.f32 %v845_v53  ;;  %vm897_vm10 = vcmp.eq.f32.partialorder %v845_v53, inf  ;;  %v900_v29 = vand.u32 2147483648, %v845_v53 }
 0x363   :  { %vm899_vm12 = vcmp.eq.f32.partialorder %v845_v53, 0.0 }
 0x364   :  { %v884_v37 = vsel %vm883_vm11, %v843_v33, %v882_v36 }
 0x365   :  { %v887_v52 = vsel %vm885_vm13, %v886_v22, %v884_v37 }
 0x366   :  { %907 = vst.msk [vmem:[%s1926_s4 + $0x28] sm:$0xff] %vm60_vm0, %v887_v52 }
 0x36a   :  { %v1204_v5 = vpop.eup %1203 }
 0x36b   :  { %v889_v24 = vmul.f32 %v1204_v5, %v844_v46 }
 0x36c   :  { %v1206_v26 = vpop.eup %1205 }
 0x36d   :  { %v891_v10 = vsel %vm890_vm7, %v844_v46, %v889_v24  ;;  %v896_v43 = vmul.f32 %v1206_v26, %v845_v53 }
 0x36e   :  { %v894_v9 = vsel %vm892_vm14, %v893_v27, %v891_v10 }
 0x36f   :  { %908 = vst.msk [vmem:[%s1926_s4 + $0x30] sm:$0xff] %vm60_vm0, %v894_v9  ;;  %v898_v57 = vsel %vm897_vm10, %v845_v53, %v896_v43 }
 0x370   :  { %v901_v25 = vsel %vm899_vm12, %v900_v29, %v898_v57 }
 0x371   :  { %909 = vst.msk [vmem:[%s1926_s4 + $0x38] sm:$0xff] %vm60_vm0, %v901_v25 }
 0x3eb   :  { %v497_v6 = vpop.xlane.xlu0 %496  ;;  %v699_v19 = vpop.xlane.xlu1 %698 }
 0x3ec   :  { %v498_v30 = vrot.slane %v497_v6, 4  ;;  %v700_v61 = vrot.slane %v699_v19, 4 }
 0x3ee   :  { %v499_v41 = vadd.f32 %v498_v30, %v497_v6  ;;  %v701_v40 = vadd.f32 %v700_v61, %v699_v19 }
 0x3ef   :  { %v797_v51 = vpop.xlane.xlu0 %796 }
 0x3f0   :  { %v500_v38 = vrot.slane %v499_v41, 2  ;;  %v798_v49 = vrot.slane %v797_v51, 4  ;;  %v702_v33 = vrot.slane %v701_v40, 2 }
 0x3f2   :  { %v799_v55 = vadd.f32 %v798_v49, %v797_v51  ;;  %v501_v45 = vadd.f32 %v500_v38, %v499_v41  ;;  %v703_v4 = vadd.f32 %v702_v33, %v701_v40 }
 0x3f4   :  { %v800_v12 = vrot.slane %v799_v55, 2  ;;  %v502_v56 = vrot.slane %v501_v45, 1  ;;  %v704_v14 = vrot.slane %v703_v4, 1 }
 0x3f6   :  { %v801_v21 = vadd.f32 %v800_v12, %v799_v55  ;;  %v503_v31 = vadd.f32 %v502_v56, %v501_v45  ;;  %v705_v13 = vadd.f32 %v704_v14, %v703_v4 }
 0x3f8   :  { %1147 = vpush %v503_v31  ;;  %v802_v63 = vrot.slane %v801_v21, 1 }
 0x3f9   :  { %1149 = vpush %v705_v13 }
 0x3fa   :  { %v803_v44 = vadd.f32 %v802_v63, %v801_v21 }
 0x3fc   :  { %1151 = vpush %v803_v44 }
 0x429   :  { %s1148_s4 = spop %1147 }
 0x42a   :  { %s505_s28 = smul.f32 0.00012207031, %s1148_s4  ;;  %s1150_s7 = spop %1149 }
 0x42b   :  { %s707_s8 = smul.f32 0.015625, %s1150_s7 }
 0x42c   :  { %911 = sst [smem:[#allocation2]] %s505_s28 }
 0x42d   :  { %s1152_s9 = spop %1151  ;;  %913 = sst [smem:[#allocation2 + $0x1]] %s707_s8 }
 0x42e   :  { %s805_s10 = smul.f32 1.5625, %s1152_s9 }
 0x430   :  { %915 = sst [smem:[#allocation2 + $0x2]] %s805_s10 }
 0x431   :  { %1218 = shalt.err (!%p1215_p4)
}
 0x432   :  { %s1224_s12 = smov [#allocation2]  }
 0x433   :  { %927 = dma.smem_to_vmem %s1224_s12, 16, %s925_s6, [#allocation3]  }
 0x434   :  { %1219 = dma.done.wait [#allocation3], 16  }
 0x435   :  { %1220 = vsyncadd [#allocation3], 4294967280 }
 0x436   :  { %933 = sfence }
 0x437   :  { %934 = vsyncpa [#allocation3], 1 }

</bundles_post_ra>
